<compile_context>
chip_gen: v7x
topology: tpu7x:2x2x1
jax: 0.10.0
libtpu: 0.0.40
codegen_flags: <defaults>
</compile_context>

<pallas_src>
import functools
import math

import jax
import jax.numpy as jnp
from jax import lax
from jax.experimental import pallas as pl
from jax.experimental.pallas import tpu as pltpu

MAX_LENGTH = 50
SOS_token = 0
_NEG_INF = -1e30  # mask value for padded vocab logits (kept f32)


def _attn_decoder_kernel(
    # ---- inputs (H->Hp, V->Vp padded to multiples of 128) ----
    enc_out_ref,          # (B, S, Hp)   f32
    enc_hid_ref,          # (2, B, Hp)   f32
    emb_ref,              # (Vp, Hp)     bf16  embedding table
    ua_ref, bu_ref,       # (Hp, Hp) bf16, (1, Hp) f32     attention.Ua
    va_ref, bv_ref,       # (Hp, Hp) bf16, (1, Hp) f32     attention.Va
    wht_ref, bht_ref,     # (2Hp, Hp) bf16, (1, Hp) f32    hidden_transform
    whid_ref, bhid_ref,   # (Hp, 4Hp) bf16, (1, 4Hp) f32   fused [Wa | Whh(r,z,n)]
    whit_ref, bhit_ref,   # (2Hp, Hp) bf16, (1, Hp) f32    hidden_input_transform
    wih_ref, bih_ref,     # (Hp, 3Hp) bf16, (1, 3Hp) f32   GRU input weights [r|z|n]
    wout_ref, bout_ref,   # (Hp, Vp) bf16, (1, Vp) f32     output proj (padded bias -1e30)
    # ---- outputs ----
    out_logits_ref,       # (L, B, Vp) f32  per-step log-softmax
    out_attn_ref,         # (L, B, S)  f32  per-step attention weights
    out_hidden_ref,       # (B, Hp)    f32  final hidden
    *, attn_scale):
    B, S, Hp = enc_out_ref.shape
    Vp = emb_ref.shape[0]
    L = out_logits_ref.shape[0]
    f32 = jnp.float32
    bf16 = jnp.bfloat16

    # ---- step-invariant precompute (hoisted out of the decode loop) ----
    enc2d = enc_out_ref[...].reshape(B * S, Hp).astype(bf16)
    keys = (jnp.dot(enc2d, ua_ref[...], preferred_element_type=f32)
            + bu_ref[...]).reshape(B, S, Hp)                        # (B, S, Hp) f32
    vals = (jnp.dot(enc2d, va_ref[...], preferred_element_type=f32)
            + bv_ref[...]).reshape(B, S, Hp)                        # (B, S, Hp) f32

    # transform_bidirectional_hidden: cat(forward, backward) @ Wht + bht (K=2Hp)
    hid_cat = jnp.concatenate([enc_hid_ref[0], enc_hid_ref[1]], axis=-1).astype(bf16)
    h0 = jnp.dot(hid_cat, wht_ref[...], preferred_element_type=f32) + bht_ref[...]  # (B, Hp)

    iota_v = lax.broadcasted_iota(jnp.int32, (B, Vp), 1)
    onehot0 = (iota_v == SOS_token).astype(bf16)                    # SOS start token

    def step(i, carry):
        hidden, onehot = carry                                      # (B,Hp) f32, (B,Vp) bf16
        h_bf = hidden.astype(bf16)

        # ---- fused hidden projection: [q | gh_r | gh_z | gh_n] in one MXU pass ----
        hp = jnp.dot(h_bf, whid_ref[...], preferred_element_type=f32) + bhid_ref[...]  # (B, 4Hp)
        q = hp[:, 0:Hp]                                              # attention query proj
        gh = hp[:, Hp:4 * Hp]                                        # GRU hidden gates (B, 3Hp)

        # embedding lookup as one-hot matmul (negligible at this vocab size)
        embedded = jnp.dot(onehot, emb_ref[...], preferred_element_type=f32)  # (B, Hp)

        # ---- CrossAttention (batched; keys/values precomputed; f32 elementwise) ----
        scores = jnp.sum(q[:, None, :] * keys, axis=-1) * attn_scale          # (B, S)
        scores = scores - jnp.max(scores, axis=-1, keepdims=True)
        p = jnp.exp(scores)
        inv_den = pl.reciprocal(jnp.sum(p, axis=-1, keepdims=True), approx=True)
        attn_w = p * inv_den                                                   # (B, S)
        context = jnp.sum(attn_w[:, :, None] * vals, axis=1)                   # (B, Hp)

        # ---- fused hidden_input_transform: cat(embedded, context) @ Whit (K=2Hp) ----
        xin = jnp.concatenate([embedded, context], axis=-1).astype(bf16)       # (B, 2Hp)
        x = jnp.dot(xin, whit_ref[...], preferred_element_type=f32) + bhit_ref[...]  # (B, Hp)

        # ---- single-step GRU cell (gate order r, z, n) ----
        gi = jnp.dot(x.astype(bf16), wih_ref[...], preferred_element_type=f32) + bih_ref[...]
        r = jax.nn.sigmoid(gi[:, 0:Hp] + gh[:, 0:Hp])
        z = jax.nn.sigmoid(gi[:, Hp:2 * Hp] + gh[:, Hp:2 * Hp])
        n = jnp.tanh(gi[:, 2 * Hp:3 * Hp] + r * gh[:, 2 * Hp:3 * Hp])
        h_new = (1.0 - z) * n + z * hidden                                      # (B, Hp) f32

        # ---- output projection + log_softmax (padded cols carry -1e30 bias, f32) ----
        logits = (jnp.dot(h_new.astype(bf16), wout_ref[...], preferred_element_type=f32)
                  + bout_ref[...])                                               # (B, Vp) f32
        m = jnp.max(logits, axis=-1, keepdims=True)
        shifted = logits - m
        logsm = shifted - jnp.log(jnp.sum(jnp.exp(shifted), axis=-1, keepdims=True))

        out_logits_ref[i] = logsm
        out_attn_ref[i] = attn_w

        # ---- greedy next token (first argmax == torch.topk(1)) -> one-hot ----
        is_max = logits >= m
        first_idx = jnp.min(jnp.where(is_max, iota_v, Vp), axis=-1, keepdims=True)
        onehot_new = (iota_v == first_idx).astype(bf16)
        return h_new, onehot_new

    h_final, _ = lax.fori_loop(0, L, step, (h0, onehot0))
    out_hidden_ref[...] = h_final


def _round_up(x, m):
    return ((x + m - 1) // m) * m


def _pad2(x, rows, cols):
    r, c = x.shape
    return jnp.pad(x, ((0, rows - r), (0, cols - c)))


def attn_decoder_forward(params, encoder_outputs, encoder_hidden):
    B, S, H = encoder_outputs.shape
    V = params["emb"].shape[0]
    L = MAX_LENGTH
    Hp = _round_up(H, 128)
    Vp = _round_up(V, 128)
    bf16 = jnp.bfloat16

    # ---- zero-pad hidden/vocab dims to lane width; weights -> bf16, biases f32 ----
    emb_p = _pad2(params["emb"], Vp, Hp).astype(bf16)

    wa_p, ba_p = _pad2(params["wa"], Hp, Hp), _pad2(params["ba"], 1, Hp)
    ua_p, bu_p = _pad2(params["ua"], Hp, Hp).astype(bf16), _pad2(params["bu"], 1, Hp)
    va_p, bv_p = _pad2(params["va"], Hp, Hp).astype(bf16), _pad2(params["bv"], 1, Hp)

    def pad_cat2(w):  # (2H, H) -> (2Hp, Hp); pad each concatenated half separately
        return jnp.concatenate([_pad2(w[:H], Hp, Hp), _pad2(w[H:], Hp, Hp)], axis=0)

    wht_p, bht_p = pad_cat2(params["wht"]).astype(bf16), _pad2(params["bht"], 1, Hp)
    whit_p, bhit_p = pad_cat2(params["whit"]).astype(bf16), _pad2(params["bhit"], 1, Hp)

    def pad_gru_w(w):  # (H, 3H) -> (Hp, 3Hp); pad each gate block separately
        gates = [w[:, k * H:(k + 1) * H] for k in range(3)]
        return jnp.concatenate([_pad2(g, Hp, Hp) for g in gates], axis=1)

    def pad_gru_b(b):  # (1, 3H) -> (1, 3Hp)
        gates = [b[:, k * H:(k + 1) * H] for k in range(3)]
        return jnp.concatenate([_pad2(g, 1, Hp) for g in gates], axis=1)

    wih_p, bih_p = pad_gru_w(params["wih"]).astype(bf16), pad_gru_b(params["bih"])
    whh_p, bhh_p = pad_gru_w(params["whh"]), pad_gru_b(params["bhh"])

    # Fused per-step hidden projection weight: hidden @ [Wa | Whh(r,z,n)] in one MXU pass.
    whid_p = jnp.concatenate([wa_p, whh_p], axis=1).astype(bf16)   # (Hp, 4Hp)
    bhid_p = jnp.concatenate([ba_p, bhh_p], axis=1)                # (1, 4Hp) f32

    wout_p = _pad2(params["wout"], Hp, Vp).astype(bf16)
    bout_p = jnp.pad(params["bout"], ((0, 0), (0, Vp - V)), constant_values=_NEG_INF)

    enc_out_p = jnp.pad(encoder_outputs, ((0, 0), (0, 0), (0, Hp - H)))
    enc_hid_p = jnp.pad(encoder_hidden, ((0, 0), (0, 0), (0, Hp - H)))

    kernel = functools.partial(_attn_decoder_kernel,
                               attn_scale=1.0 / math.sqrt(float(H)))

    out_shapes = (
        jax.ShapeDtypeStruct((L, B, Vp), jnp.float32),   # per-step log-probs
        jax.ShapeDtypeStruct((L, B, S), jnp.float32),    # per-step attention
        jax.ShapeDtypeStruct((B, Hp), jnp.float32),      # final hidden
    )

    # Single invocation (grid=()): all operands resident in VMEM; whole decode
    # loop runs as an in-kernel fori_loop, outputs DMA'd back to HBM once.
    logits_lbv, attn_lbs, h_final = pl.pallas_call(
        kernel,
        out_shape=out_shapes,
        compiler_params=pltpu.CompilerParams(vmem_limit_bytes=32 * 1024 * 1024),
    )(
        enc_out_p, enc_hid_p, emb_p,
        ua_p, bu_p, va_p, bv_p,
        wht_p, bht_p,
        whid_p, bhid_p,
        whit_p, bhit_p,
        wih_p, bih_p,
        wout_p, bout_p,
    )

    decoder_outputs = jnp.transpose(logits_lbv, (1, 0, 2))[:, :, :V]   # (B, L, V) log-softmax
    attentions = jnp.transpose(attn_lbs, (1, 0, 2))                    # (B, L, S)
    decoder_hidden = h_final[None, :, :H]                              # (1, B, H)
    return decoder_outputs, decoder_hidden, attentions


def init_params(key, hidden_size, output_size):
    """Deterministic synthetic parameters (PyTorch-style uniform fan-in init)."""
    H, V = hidden_size, output_size
    ks = jax.random.split(key, 17)

    def u(k, shape, fan_in):
        bound = 1.0 / math.sqrt(float(fan_in))
        return jax.random.uniform(k, shape, jnp.float32, -bound, bound)

    return {
        "emb":  jax.random.normal(ks[0], (V, H), jnp.float32),        # nn.Embedding ~ N(0,1)
        "wa":   u(ks[1], (H, H), H),       "ba":   u(ks[2], (1, H), H),
        "ua":   u(ks[3], (H, H), H),       "bu":   u(ks[4], (1, H), H),
        "va":   u(ks[5], (H, H), H),       "bv":   u(ks[6], (1, H), H),
        "wht":  u(ks[7], (2 * H, H), 2 * H),  "bht":  u(ks[8], (1, H), 2 * H),
        "whit": u(ks[9], (2 * H, H), 2 * H),  "bhit": u(ks[10], (1, H), 2 * H),
        "wih":  u(ks[11], (H, 3 * H), H),  "bih":  u(ks[12], (1, 3 * H), H),
        "whh":  u(ks[13], (H, 3 * H), H),  "bhh":  u(ks[14], (1, 3 * H), H),
        "wout": u(ks[15], (H, V), H),      "bout": u(ks[16], (1, V), H),
    }


if __name__ == "__main__":
    B, S, H, V = 2, 8, 32, 32   # batch, encoder seq len, hidden_size, output_size

    key = jax.random.PRNGKey(0)
    k_params, k_enc, k_hid = jax.random.split(key, 3)

    params = init_params(k_params, H, V)
    encoder_outputs = jax.random.normal(k_enc, (B, S, H), jnp.float32)
    encoder_hidden = jax.random.normal(k_hid, (2, B, H), jnp.float32)  # bidirectional, n_layers=1

    dec_out, dec_hidden, attns = attn_decoder_forward(params, encoder_outputs, encoder_hidden)
    jax.block_until_ready(dec_out)
    jax.block_until_ready(dec_hidden)
    jax.block_until_ready(attns)

    assert dec_out.shape == (B, MAX_LENGTH, V)
    assert dec_hidden.shape == (1, B, H)
    assert attns.shape == (B, MAX_LENGTH, S)
    assert bool(jnp.all(jnp.isfinite(dec_out)))
    assert bool(jnp.all(jnp.isfinite(attns)))
    # attention rows must (approximately) sum to 1
    assert bool(jnp.all(jnp.abs(jnp.sum(attns, axis=-1) - 1.0) < 1e-2))
    print("KERNEL_OK")
</pallas_src>

<mosaic_0001>
module attributes {stable_mosaic.version = 11 : i64} {
  func.func @_attn_decoder_kernel(%arg0: memref<2x8x128xf32, #tpu.memory_space<vmem>>, %arg1: memref<2x2x128xf32, #tpu.memory_space<vmem>>, %arg2: memref<128x128xbf16, #tpu.memory_space<vmem>>, %arg3: memref<128x128xbf16, #tpu.memory_space<vmem>>, %arg4: memref<1x128xf32, #tpu.memory_space<vmem>>, %arg5: memref<128x128xbf16, #tpu.memory_space<vmem>>, %arg6: memref<1x128xf32, #tpu.memory_space<vmem>>, %arg7: memref<256x128xbf16, #tpu.memory_space<vmem>>, %arg8: memref<1x128xf32, #tpu.memory_space<vmem>>, %arg9: memref<128x512xbf16, #tpu.memory_space<vmem>>, %arg10: memref<1x512xf32, #tpu.memory_space<vmem>>, %arg11: memref<256x128xbf16, #tpu.memory_space<vmem>>, %arg12: memref<1x128xf32, #tpu.memory_space<vmem>>, %arg13: memref<128x384xbf16, #tpu.memory_space<vmem>>, %arg14: memref<1x384xf32, #tpu.memory_space<vmem>>, %arg15: memref<128x128xbf16, #tpu.memory_space<vmem>>, %arg16: memref<1x128xf32, #tpu.memory_space<vmem>>, %arg17: memref<50x2x128xf32, #tpu.memory_space<vmem>>, %arg18: memref<50x2x8xf32, #tpu.memory_space<vmem>>, %arg19: memref<2x128xf32, #tpu.memory_space<vmem>>) attributes {dimension_semantics = [], scalar_prefetch = 0 : i64, scratch_operands = 0 : i64, tpu.core_type = #tpu.core_type<tc>} {
    %c0 = arith.constant 0 : index
    %c0_0 = arith.constant 0 : index
    %c0_1 = arith.constant 0 : index
    %0 = vector.load %arg0[%c0, %c0_0, %c0_1] : memref<2x8x128xf32, #tpu.memory_space<vmem>>, vector<2x8x128xf32>
    %1 = vector.shape_cast %0 : vector<2x8x128xf32> to vector<16x128xf32>
    %2 = arith.truncf %1 : vector<16x128xf32> to vector<16x128xbf16>
    %c0_2 = arith.constant 0 : index
    %c0_3 = arith.constant 0 : index
    %3 = vector.load %arg3[%c0_2, %c0_3] : memref<128x128xbf16, #tpu.memory_space<vmem>>, vector<128x128xbf16>
    %cst = arith.constant dense<0.000000e+00> : vector<16x128xf32>
    %4 = tpu.matmul %2, %3, %cst {dimension_numbers = #tpu.dot_dimension_numbers<[1], [0], [0], [1], [0, 0, 1, 1], [], []>} : vector<16x128xbf16>, vector<128x128xbf16>, vector<16x128xf32> -> vector<16x128xf32>
    %c0_4 = arith.constant 0 : index
    %c0_5 = arith.constant 0 : index
    %5 = vector.load %arg4[%c0_4, %c0_5] : memref<1x128xf32, #tpu.memory_space<vmem>>, vector<1x128xf32>
    %6 = vector.broadcast %5 : vector<1x128xf32> to vector<16x128xf32>
    %7 = arith.addf %4, %6 : vector<16x128xf32>
    %8 = vector.shape_cast %7 : vector<16x128xf32> to vector<2x8x128xf32>
    %c0_6 = arith.constant 0 : index
    %c0_7 = arith.constant 0 : index
    %9 = vector.load %arg5[%c0_6, %c0_7] : memref<128x128xbf16, #tpu.memory_space<vmem>>, vector<128x128xbf16>
    %cst_8 = arith.constant dense<0.000000e+00> : vector<16x128xf32>
    %10 = tpu.matmul %2, %9, %cst_8 {dimension_numbers = #tpu.dot_dimension_numbers<[1], [0], [0], [1], [0, 0, 1, 1], [], []>} : vector<16x128xbf16>, vector<128x128xbf16>, vector<16x128xf32> -> vector<16x128xf32>
    %c0_9 = arith.constant 0 : index
    %c0_10 = arith.constant 0 : index
    %11 = vector.load %arg6[%c0_9, %c0_10] : memref<1x128xf32, #tpu.memory_space<vmem>>, vector<1x128xf32>
    %12 = vector.broadcast %11 : vector<1x128xf32> to vector<16x128xf32>
    %13 = arith.addf %10, %12 : vector<16x128xf32>
    %14 = vector.shape_cast %13 : vector<16x128xf32> to vector<2x8x128xf32>
    %c0_11 = arith.constant 0 : index
    %c0_12 = arith.constant 0 : index
    %c0_13 = arith.constant 0 : index
    %15 = vector.load %arg1[%c0_11, %c0_12, %c0_13] : memref<2x2x128xf32, #tpu.memory_space<vmem>>, vector<1x2x128xf32>
    %16 = vector.shape_cast %15 : vector<1x2x128xf32> to vector<2x128xf32>
    %c1 = arith.constant 1 : index
    %c0_14 = arith.constant 0 : index
    %c0_15 = arith.constant 0 : index
    %17 = vector.load %arg1[%c1, %c0_14, %c0_15] : memref<2x2x128xf32, #tpu.memory_space<vmem>>, vector<1x2x128xf32>
    %18 = vector.shape_cast %17 : vector<1x2x128xf32> to vector<2x128xf32>
    %19 = tpu.concatenate %16, %18 in 1 : vector<2x128xf32>, vector<2x128xf32> -> vector<2x256xf32>
    %20 = arith.truncf %19 : vector<2x256xf32> to vector<2x256xbf16>
    %c0_16 = arith.constant 0 : index
    %c0_17 = arith.constant 0 : index
    %21 = vector.load %arg7[%c0_16, %c0_17] : memref<256x128xbf16, #tpu.memory_space<vmem>>, vector<256x128xbf16>
    %cst_18 = arith.constant dense<0.000000e+00> : vector<2x128xf32>
    %22 = tpu.matmul %20, %21, %cst_18 {dimension_numbers = #tpu.dot_dimension_numbers<[1], [0], [0], [1], [0, 0, 1, 1], [], []>} : vector<2x256xbf16>, vector<256x128xbf16>, vector<2x128xf32> -> vector<2x128xf32>
    %c0_19 = arith.constant 0 : index
    %c0_20 = arith.constant 0 : index
    %23 = vector.load %arg8[%c0_19, %c0_20] : memref<1x128xf32, #tpu.memory_space<vmem>>, vector<1x128xf32>
    %24 = vector.broadcast %23 : vector<1x128xf32> to vector<2x128xf32>
    %25 = arith.addf %22, %24 : vector<2x128xf32>
    %26 = tpu.iota {dimensions = array<i32: 1>} : vector<2x128xi32>
    %c0_i32 = arith.constant 0 : i32
    %27 = vector.broadcast %c0_i32 : i32 to vector<2x128xi32>
    %28 = arith.cmpi eq, %26, %27 : vector<2x128xi32>
    %29 = arith.extui %28 : vector<2x128xi1> to vector<2x128xi32>
    %30 = arith.sitofp %29 : vector<2x128xi32> to vector<2x128xf32>
    %31 = arith.truncf %30 : vector<2x128xf32> to vector<2x128xbf16>
    %c0_i32_21 = arith.constant 0 : i32
    %c50_i32 = arith.constant 50 : i32
    %32 = arith.addi %c0_i32_21, %c50_i32 : i32
    %c1_i32 = arith.constant 1 : i32
    %33:2 = scf.for %arg20 = %c0_i32_21 to %32 step %c1_i32 iter_args(%arg21 = %25, %arg22 = %31) -> (vector<2x128xf32>, vector<2x128xbf16>)  : i32 {
      %35 = arith.truncf %arg21 : vector<2x128xf32> to vector<2x128xbf16>
      %c0_25 = arith.constant 0 : index
      %c0_26 = arith.constant 0 : index
      %36 = vector.load %arg9[%c0_25, %c0_26] : memref<128x512xbf16, #tpu.memory_space<vmem>>, vector<128x512xbf16>
      %cst_27 = arith.constant dense<0.000000e+00> : vector<2x512xf32>
      %37 = tpu.matmul %35, %36, %cst_27 {dimension_numbers = #tpu.dot_dimension_numbers<[1], [0], [0], [1], [0, 0, 1, 1], [], []>} : vector<2x128xbf16>, vector<128x512xbf16>, vector<2x512xf32> -> vector<2x512xf32>
      %c0_28 = arith.constant 0 : index
      %c0_29 = arith.constant 0 : index
      %38 = vector.load %arg10[%c0_28, %c0_29] : memref<1x512xf32, #tpu.memory_space<vmem>>, vector<1x512xf32>
      %39 = vector.broadcast %38 : vector<1x512xf32> to vector<2x512xf32>
      %40 = arith.addf %37, %39 : vector<2x512xf32>
      %41 = vector.extract_strided_slice %40 {offsets = [0, 0], sizes = [2, 128], strides = [1, 1]} : vector<2x512xf32> to vector<2x128xf32>
      %42 = vector.extract_strided_slice %40 {offsets = [0, 128], sizes = [2, 384], strides = [1, 1]} : vector<2x512xf32> to vector<2x384xf32>
      %c0_30 = arith.constant 0 : index
      %c0_31 = arith.constant 0 : index
      %43 = vector.load %arg2[%c0_30, %c0_31] : memref<128x128xbf16, #tpu.memory_space<vmem>>, vector<128x128xbf16>
      %cst_32 = arith.constant dense<0.000000e+00> : vector<2x128xf32>
      %44 = tpu.matmul %arg22, %43, %cst_32 {dimension_numbers = #tpu.dot_dimension_numbers<[1], [0], [0], [1], [0, 0, 1, 1], [], []>} : vector<2x128xbf16>, vector<128x128xbf16>, vector<2x128xf32> -> vector<2x128xf32>
      %45 = vector.shape_cast %41 : vector<2x128xf32> to vector<2x1x128xf32>
      %46 = vector.broadcast %45 : vector<2x1x128xf32> to vector<2x8x128xf32>
      %47 = arith.mulf %46, %8 : vector<2x8x128xf32>
      %cst_33 = arith.constant dense<0.000000e+00> : vector<2x8xf32>
      %48 = vector.multi_reduction <add>, %47, %cst_33 [2] : vector<2x8x128xf32> to vector<2x8xf32>
      %cst_34 = arith.constant 0.176776692 : f32
      %49 = vector.broadcast %cst_34 : f32 to vector<2x8xf32>
      %50 = arith.mulf %48, %49 : vector<2x8xf32>
      %cst_35 = arith.constant dense<0xFF800000> : vector<2xf32>
      %51 = vector.multi_reduction <maximumf>, %50, %cst_35 [1] : vector<2x8xf32> to vector<2xf32>
      %52 = vector.shape_cast %51 : vector<2xf32> to vector<2x1xf32>
      %53 = vector.broadcast %52 : vector<2x1xf32> to vector<2x8xf32>
      %54 = arith.subf %50, %53 : vector<2x8xf32>
      %55 = math.exp %54 : vector<2x8xf32>
      %cst_36 = arith.constant dense<0.000000e+00> : vector<2xf32>
      %56 = vector.multi_reduction <add>, %55, %cst_36 [1] : vector<2x8xf32> to vector<2xf32>
      %57 = vector.shape_cast %56 : vector<2xf32> to vector<2x1xf32>
      %58 = tpu.reciprocal %57 {approx = true} : vector<2x1xf32> -> vector<2x1xf32>
      %59 = vector.broadcast %58 : vector<2x1xf32> to vector<2x8xf32>
      %60 = arith.mulf %55, %59 : vector<2x8xf32>
      %61 = vector.shape_cast %60 : vector<2x8xf32> to vector<2x8x1xf32>
      %62 = vector.broadcast %61 : vector<2x8x1xf32> to vector<2x8x128xf32>
      %63 = arith.mulf %62, %14 : vector<2x8x128xf32>
      %cst_37 = arith.constant dense<0.000000e+00> : vector<2x128xf32>
      %64 = vector.multi_reduction <add>, %63, %cst_37 [1] : vector<2x8x128xf32> to vector<2x128xf32>
      %65 = tpu.concatenate %44, %64 in 1 : vector<2x128xf32>, vector<2x128xf32> -> vector<2x256xf32>
      %66 = arith.truncf %65 : vector<2x256xf32> to vector<2x256xbf16>
      %c0_38 = arith.constant 0 : index
      %c0_39 = arith.constant 0 : index
      %67 = vector.load %arg11[%c0_38, %c0_39] : memref<256x128xbf16, #tpu.memory_space<vmem>>, vector<256x128xbf16>
      %cst_40 = arith.constant dense<0.000000e+00> : vector<2x128xf32>
      %68 = tpu.matmul %66, %67, %cst_40 {dimension_numbers = #tpu.dot_dimension_numbers<[1], [0], [0], [1], [0, 0, 1, 1], [], []>} : vector<2x256xbf16>, vector<256x128xbf16>, vector<2x128xf32> -> vector<2x128xf32>
      %c0_41 = arith.constant 0 : index
      %c0_42 = arith.constant 0 : index
      %69 = vector.load %arg12[%c0_41, %c0_42] : memref<1x128xf32, #tpu.memory_space<vmem>>, vector<1x128xf32>
      %70 = vector.broadcast %69 : vector<1x128xf32> to vector<2x128xf32>
      %71 = arith.addf %68, %70 : vector<2x128xf32>
      %72 = arith.truncf %71 : vector<2x128xf32> to vector<2x128xbf16>
      %c0_43 = arith.constant 0 : index
      %c0_44 = arith.constant 0 : index
      %73 = vector.load %arg13[%c0_43, %c0_44] : memref<128x384xbf16, #tpu.memory_space<vmem>>, vector<128x384xbf16>
      %cst_45 = arith.constant dense<0.000000e+00> : vector<2x384xf32>
      %74 = tpu.matmul %72, %73, %cst_45 {dimension_numbers = #tpu.dot_dimension_numbers<[1], [0], [0], [1], [0, 0, 1, 1], [], []>} : vector<2x128xbf16>, vector<128x384xbf16>, vector<2x384xf32> -> vector<2x384xf32>
      %c0_46 = arith.constant 0 : index
      %c0_47 = arith.constant 0 : index
      %75 = vector.load %arg14[%c0_46, %c0_47] : memref<1x384xf32, #tpu.memory_space<vmem>>, vector<1x384xf32>
      %76 = vector.broadcast %75 : vector<1x384xf32> to vector<2x384xf32>
      %77 = arith.addf %74, %76 : vector<2x384xf32>
      %78 = vector.extract_strided_slice %77 {offsets = [0, 0], sizes = [2, 128], strides = [1, 1]} : vector<2x384xf32> to vector<2x128xf32>
      %79 = vector.extract_strided_slice %42 {offsets = [0, 0], sizes = [2, 128], strides = [1, 1]} : vector<2x384xf32> to vector<2x128xf32>
      %80 = arith.addf %78, %79 : vector<2x128xf32>
      %81 = arith.negf %80 : vector<2x128xf32>
      %82 = math.exp %81 : vector<2x128xf32>
      %cst_48 = arith.constant 1.000000e+00 : f32
      %83 = vector.broadcast %cst_48 : f32 to vector<2x128xf32>
      %84 = arith.addf %83, %82 : vector<2x128xf32>
      %85 = arith.divf %83, %84 : vector<2x128xf32>
      %86 = vector.extract_strided_slice %77 {offsets = [0, 128], sizes = [2, 128], strides = [1, 1]} : vector<2x384xf32> to vector<2x128xf32>
      %87 = vector.extract_strided_slice %42 {offsets = [0, 128], sizes = [2, 128], strides = [1, 1]} : vector<2x384xf32> to vector<2x128xf32>
      %88 = arith.addf %86, %87 : vector<2x128xf32>
      %89 = arith.negf %88 : vector<2x128xf32>
      %90 = math.exp %89 : vector<2x128xf32>
      %cst_49 = arith.constant 1.000000e+00 : f32
      %91 = vector.broadcast %cst_49 : f32 to vector<2x128xf32>
      %92 = arith.addf %91, %90 : vector<2x128xf32>
      %93 = arith.divf %91, %92 : vector<2x128xf32>
      %94 = vector.extract_strided_slice %77 {offsets = [0, 256], sizes = [2, 128], strides = [1, 1]} : vector<2x384xf32> to vector<2x128xf32>
      %95 = vector.extract_strided_slice %42 {offsets = [0, 256], sizes = [2, 128], strides = [1, 1]} : vector<2x384xf32> to vector<2x128xf32>
      %96 = arith.mulf %85, %95 : vector<2x128xf32>
      %97 = arith.addf %94, %96 : vector<2x128xf32>
      %98 = math.tanh %97 : vector<2x128xf32>
      %cst_50 = arith.constant 1.000000e+00 : f32
      %99 = vector.broadcast %cst_50 : f32 to vector<2x128xf32>
      %100 = arith.subf %99, %93 : vector<2x128xf32>
      %101 = arith.mulf %100, %98 : vector<2x128xf32>
      %102 = arith.mulf %93, %arg21 : vector<2x128xf32>
      %103 = arith.addf %101, %102 : vector<2x128xf32>
      %104 = arith.truncf %103 : vector<2x128xf32> to vector<2x128xbf16>
      %c0_51 = arith.constant 0 : index
      %c0_52 = arith.constant 0 : index
      %105 = vector.load %arg15[%c0_51, %c0_52] : memref<128x128xbf16, #tpu.memory_space<vmem>>, vector<128x128xbf16>
      %cst_53 = arith.constant dense<0.000000e+00> : vector<2x128xf32>
      %106 = tpu.matmul %104, %105, %cst_53 {dimension_numbers = #tpu.dot_dimension_numbers<[1], [0], [0], [1], [0, 0, 1, 1], [], []>} : vector<2x128xbf16>, vector<128x128xbf16>, vector<2x128xf32> -> vector<2x128xf32>
      %c0_54 = arith.constant 0 : index
      %c0_55 = arith.constant 0 : index
      %107 = vector.load %arg16[%c0_54, %c0_55] : memref<1x128xf32, #tpu.memory_space<vmem>>, vector<1x128xf32>
      %108 = vector.broadcast %107 : vector<1x128xf32> to vector<2x128xf32>
      %109 = arith.addf %106, %108 : vector<2x128xf32>
      %cst_56 = arith.constant dense<0xFF800000> : vector<2xf32>
      %110 = vector.multi_reduction <maximumf>, %109, %cst_56 [1] : vector<2x128xf32> to vector<2xf32>
      %111 = vector.shape_cast %110 : vector<2xf32> to vector<2x1xf32>
      %112 = vector.broadcast %111 : vector<2x1xf32> to vector<2x128xf32>
      %113 = arith.subf %109, %112 : vector<2x128xf32>
      %114 = math.exp %113 : vector<2x128xf32>
      %cst_57 = arith.constant dense<0.000000e+00> : vector<2xf32>
      %115 = vector.multi_reduction <add>, %114, %cst_57 [1] : vector<2x128xf32> to vector<2xf32>
      %116 = vector.shape_cast %115 : vector<2xf32> to vector<2x1xf32>
      %117 = math.log %116 : vector<2x1xf32>
      %118 = vector.broadcast %117 : vector<2x1xf32> to vector<2x128xf32>
      %119 = arith.subf %113, %118 : vector<2x128xf32>
      %120 = arith.index_cast %arg20 : i32 to index
      %c0_58 = arith.constant 0 : index
      %c0_59 = arith.constant 0 : index
      %121 = vector.load %arg17[%120, %c0_58, %c0_59] : memref<50x2x128xf32, #tpu.memory_space<vmem>>, vector<1x2x128xf32>
      %122 = vector.shape_cast %121 : vector<1x2x128xf32> to vector<2x128xf32>
      %123 = vector.shape_cast %119 : vector<2x128xf32> to vector<1x2x128xf32>
      tpu.vector_store %arg17[%120, %c0_58, %c0_59], %123 {strides = array<i32>} : memref<50x2x128xf32, #tpu.memory_space<vmem>>, vector<1x2x128xf32>,
      %124 = arith.index_cast %arg20 : i32 to index
      %c0_60 = arith.constant 0 : index
      %c0_61 = arith.constant 0 : index
      %125 = vector.load %arg18[%124, %c0_60, %c0_61] : memref<50x2x8xf32, #tpu.memory_space<vmem>>, vector<1x2x8xf32>
      %126 = vector.shape_cast %125 : vector<1x2x8xf32> to vector<2x8xf32>
      %127 = vector.shape_cast %60 : vector<2x8xf32> to vector<1x2x8xf32>
      tpu.vector_store %arg18[%124, %c0_60, %c0_61], %127 {strides = array<i32>} : memref<50x2x8xf32, #tpu.memory_space<vmem>>, vector<1x2x8xf32>,
      %128 = vector.broadcast %111 : vector<2x1xf32> to vector<2x128xf32>
      %129 = arith.cmpf oge, %109, %128 : vector<2x128xf32>
      %c128_i32 = arith.constant 128 : i32
      %130 = vector.broadcast %c128_i32 : i32 to vector<2x128xi32>
      %131 = arith.select %129, %26, %130 : vector<2x128xi1>, vector<2x128xi32>
      %cst_62 = arith.constant dense<2147483647> : vector<2xi32>
      %132 = vector.multi_reduction <minsi>, %131, %cst_62 [1] : vector<2x128xi32> to vector<2xi32>
      %133 = vector.shape_cast %132 : vector<2xi32> to vector<2x1xi32>
      %134 = vector.broadcast %133 : vector<2x1xi32> to vector<2x128xi32>
      %135 = arith.cmpi eq, %26, %134 : vector<2x128xi32>
      %136 = arith.extui %135 : vector<2x128xi1> to vector<2x128xi32>
      %137 = arith.sitofp %136 : vector<2x128xi32> to vector<2x128xf32>
      %138 = arith.truncf %137 : vector<2x128xf32> to vector<2x128xbf16>
      scf.yield %103, %138 : vector<2x128xf32>, vector<2x128xbf16>
    }
    %c50_i32_22 = arith.constant 50 : i32
    %c0_23 = arith.constant 0 : index
    %c0_24 = arith.constant 0 : index
    %34 = vector.load %arg19[%c0_23, %c0_24] : memref<2x128xf32, #tpu.memory_space<vmem>>, vector<2x128xf32>
    tpu.vector_store %arg19[%c0_23, %c0_24], %33#0 {strides = array<i32>} : memref<2x128xf32, #tpu.memory_space<vmem>>, vector<2x128xf32>,
    return
  }
}

</mosaic_0001>

<bundles_post_ra>
// kernel: tpu_custom_call.1
= control target key start
LH: loop header
LB: loop body
LE: loop exit
PB: predicated region body
PF: predicated region fallthrough
CT: control target
= control target key end

     0   :  { %s3177_s0 = inlined_call_operand.hbm [shape: f32[2,8,128], index: 0, kind: input, shape index: {}]   ;;  %s3178_s1 = inlined_call_operand.hbm [shape: f32[2,2,128], index: 1, kind: input, shape index: {}]   ;;  %s3179_s2 = inlined_call_operand.hbm [shape: bf16[128,128], index: 2, kind: input, shape index: {}]   ;;  %s3180_s3 = inlined_call_operand.hbm [shape: bf16[128,128], index: 3, kind: input, shape index: {}]   ;;  %s3181_s4 = inlined_call_operand.vmem [shape: f32[1,128], index: 4, kind: input, shape index: {}]   ;;  %s3182_s5 = inlined_call_operand.hbm [shape: bf16[128,128], index: 5, kind: input, shape index: {}]   ;;  %s3183_s6 = inlined_call_operand.vmem [shape: f32[1,128], index: 6, kind: input, shape index: {}]   ;;  %s3184_s7 = inlined_call_operand.hbm [shape: bf16[256,128], index: 7, kind: input, shape index: {}]   ;;  %s3185_s8 = inlined_call_operand.vmem [shape: f32[1,128], index: 8, kind: input, shape index: {}]   ;;  %s3186_s9 = inlined_call_operand.hbm [shape: bf16[128,512], index: 9, kind: input, shape index: {}]   ;;  %s3187_s10 = inlined_call_operand.vmem [shape: f32[1,512], index: 10, kind: input, shape index: {}]   ;;  %s3188_s11 = inlined_call_operand.hbm [shape: bf16[256,128], index: 11, kind: input, shape index: {}]   ;;  %s3189_s12 = inlined_call_operand.vmem [shape: f32[1,128], index: 12, kind: input, shape index: {}]   ;;  %s3190_s13 = inlined_call_operand.hbm [shape: bf16[128,384], index: 13, kind: input, shape index: {}]   ;;  %s3191_s14 = inlined_call_operand.vmem [shape: f32[1,384], index: 14, kind: input, shape index: {}]   ;;  %s3192_s15 = inlined_call_operand.hbm [shape: bf16[128,128], index: 15, kind: input, shape index: {}]   ;;  %s3193_s16 = inlined_call_operand.vmem [shape: f32[1,128], index: 16, kind: input, shape index: {}]   ;;  %s3194_s17 = inlined_call_operand.hbm [shape: f32[50,2,128], index: 17, kind: output, shape index: {0}]   ;;  %s3195_s18 = inlined_call_operand.vmem [shape: f32[50,2,8], index: 18, kind: output, shape index: {1}]   ;;  %s3196_s19 = inlined_call_operand.hbm [shape: f32[2,128], index: 19, kind: output, shape index: {2}]  }
   0x1   :  { %3205 = sst [smem:[#allocation30_spill]] %s3177_s0 }
   0x2   :  { %3206 = sst [smem:[#allocation31_spill]] %s3178_s1 }
   0x3   :  { %3207 = sst [smem:[#allocation32_spill]] %s3179_s2 }
   0x4   :  { %3208 = sst [smem:[#allocation33_spill]] %s3180_s3 }
   0x5   :  { %3209 = sst [smem:[#allocation34_spill]] %s3193_s16 }
   0x6   :  { %3210 = sst [smem:[#allocation35_spill]] %s3194_s17 }
   0x7   :  { %3211 = sst [smem:[#allocation36_spill]] %s3196_s19 }
   0x8   :  { %25 = vsyncpa [#allocation3], 0 }
   0x9   :  { %26 = vsyncpa [#allocation6], 0 }
   0xa   :  { %27 = vsyncpa [#allocation9], 0 }
   0xb   :  { %28 = vsyncpa [#allocation12], 0 }
   0xc   :  { %29 = vsyncpa [#allocation15], 0 }
   0xd   :  { %30 = vsyncpa [#allocation18], 0 }
   0xe   :  { %31 = vsyncpa [#allocation4], 0 }
   0xf   :  { %32 = vsyncpa [#allocation21], 0  ;;  %s2673_s0 = smov [#allocation5]   ;;  %s3212_s1 = sld [smem:[#allocation31_spill]] }
  0x10   :  { %s50_s30 = sshll.u32 %s2673_s0, 4  ;;  %s51_s30 = int_to_ptr.vmem [resolvable:$true] %s50_s30 }
  0x15   :  { %s2369_s22 = scalar_lea.hbm %s3212_s1, 64 }
  0x16   :  { %p2370_p0 = scmp.ne.s32.totalorder %s3212_s1, %s2369_s22  ;;  %p2373_p1 = scmp.lt.u32.totalorder %s2369_s22, %s3212_s1 }
  0x18   :  { %p2375_p2 = pnand %p2373_p1, %p2370_p0 }
  0x1a   :  { %2378 = shalt.err (!%p2375_p2)
}
  0x1b   :  { %s2379_s3 = scalar_lea.vmem %s51_s30, 64  ;;  %p2384_p4 = scmp.lt.s32.totalorder %s51_s30, %s51_s30 }
  0x1c   :  { %p2380_p3 = scmp.ne.s32.totalorder %s51_s30, %s2379_s3  ;;  %p2385_p5 = scmp.lt.s32.totalorder %s2379_s3, %s2379_s3 }
  0x1e   :  { %p2386_p6 = por %p2385_p5, %p2384_p4 }
  0x20   :  { %p2387_p7 = pnand %p2386_p6, %p2380_p3 }
  0x22   :  { %2390 = shalt.err (!%p2387_p7)
}
  0x23   :  { %s3203_s26 = smov 32   ;;  %s3204_s27 = smov 2  }
  0x24   :  { %56 = dma.hbm_to_vmem [thread:$0]  %s3212_s1, 64, %s51_s30, [#allocation6], %s3203_s26, %s3203_s26, %s3204_s27  }
  0x25   :  { %s2676_s0 = smov [#allocation8]   ;;  %s2677_s21 = smov [#allocation11]  }
  0x26   :  { %s74_s20 = sshll.u32 %s2676_s0, 4  ;;  %s102_s22 = sshll.u32 %s2677_s21, 4  ;;  %s75_s20 = int_to_ptr.vmem [resolvable:$true] %s74_s20  ;;  %s103_s22 = int_to_ptr.vmem [resolvable:$true] %s102_s22 }
  0x27   :  { %s3213_s24 = sld [smem:[#allocation33_spill]] }
  0x2d   :  { %s2391_s25 = scalar_lea.hbm %s3213_s24, 1024 }
  0x2e   :  { %p2392_p8 = scmp.ne.s32.totalorder %s3213_s24, %s2391_s25  ;;  %p2395_p9 = scmp.lt.u32.totalorder %s2391_s25, %s3213_s24 }
  0x30   :  { %p2397_p10 = pnand %p2395_p9, %p2392_p8 }
  0x32   :  { %2400 = shalt.err (!%p2397_p10)
}
  0x33   :  { %s2401_s30 = scalar_lea.vmem %s75_s20, 1024  ;;  %p2406_p12 = scmp.lt.s32.totalorder %s75_s20, %s75_s20 }
  0x34   :  { %p2402_p11 = scmp.ne.s32.totalorder %s75_s20, %s2401_s30  ;;  %p2407_p13 = scmp.lt.s32.totalorder %s2401_s30, %s2401_s30 }
  0x36   :  { %p2408_p0 = por %p2407_p13, %p2406_p12 }
  0x38   :  { %p2409_p1 = pnand %p2408_p0, %p2402_p11 }
  0x3a   :  { %2412 = shalt.err (!%p2409_p1)
}
  0x3b   :  { %s2678_s1 = smov 64   ;;  %s2679_s28 = smov 4  }
  0x3c   :  { %80 = dma.hbm_to_vmem [thread:$0]  %s3213_s24, 1024, %s75_s20, [#allocation9], %s2678_s1, %s2678_s1, %s2679_s28  }
  0x3d   :  { %s2413_s0 = scalar_lea.hbm %s3184_s7, 2048 }
  0x3e   :  { %p2414_p2 = scmp.ne.s32.totalorder %s3184_s7, %s2413_s0  ;;  %p2417_p3 = scmp.lt.u32.totalorder %s2413_s0, %s3184_s7 }
  0x40   :  { %p2419_p4 = pnand %p2417_p3, %p2414_p2 }
  0x42   :  { %2422 = shalt.err (!%p2419_p4)
}
  0x43   :  { %s2423_s3 = scalar_lea.vmem %s103_s22, 2048  ;;  %p2428_p6 = scmp.lt.s32.totalorder %s103_s22, %s103_s22 }
  0x44   :  { %p2424_p5 = scmp.ne.s32.totalorder %s103_s22, %s2423_s3  ;;  %p2429_p7 = scmp.lt.s32.totalorder %s2423_s3, %s2423_s3 }
  0x46   :  { %p2430_p8 = por %p2429_p7, %p2428_p6 }
  0x48   :  { %p2431_p9 = pnand %p2430_p8, %p2424_p5 }
  0x4a   :  { %2434 = shalt.err (!%p2431_p9)
}
  0x4b   :  { %108 = dma.hbm_to_vmem [thread:$0]  %s3184_s7, 2048, %s103_s22, [#allocation12], %s2678_s1, %s2678_s1, %s2679_s28  }
  0x4c   :  { %s2680_s30 = smov [#allocation14]   ;;  %s2681_s29 = smov [#allocation2]  }
  0x4d   :  { %s130_s19 = sshll.u32 %s2680_s30, 4  ;;  %s38_s16 = sshll.u32 %s2681_s29, 4  ;;  %s131_s19 = int_to_ptr.vmem [resolvable:$true] %s130_s19  ;;  %s39_s16 = int_to_ptr.vmem [resolvable:$true] %s38_s16 }
  0x4e   :  { %s2435_s21 = scalar_lea.hbm %s3188_s11, 2048 }
  0x4f   :  { %p2436_p10 = scmp.ne.s32.totalorder %s3188_s11, %s2435_s21  ;;  %p2439_p11 = scmp.lt.u32.totalorder %s2435_s21, %s3188_s11 }
  0x51   :  { %p2441_p12 = pnand %p2439_p11, %p2436_p10 }
  0x53   :  { %2444 = shalt.err (!%p2441_p12)
}
  0x54   :  { %s2445_s7 = scalar_lea.vmem %s131_s19, 2048  ;;  %p2450_p0 = scmp.lt.s32.totalorder %s131_s19, %s131_s19 }
  0x55   :  { %p2446_p13 = scmp.ne.s32.totalorder %s131_s19, %s2445_s7  ;;  %p2451_p1 = scmp.lt.s32.totalorder %s2445_s7, %s2445_s7 }
  0x57   :  { %p2452_p2 = por %p2451_p1, %p2450_p0 }
  0x59   :  { %p2453_p3 = pnand %p2452_p2, %p2446_p13 }
  0x5b   :  { %2456 = shalt.err (!%p2453_p3)
}
  0x5c   :  { %136 = dma.hbm_to_vmem [thread:$0]  %s3188_s11, 2048, %s131_s19, [#allocation15], %s2678_s1, %s2678_s1, %s2679_s28  }
  0x5d   :  { %s3214_s29 = sld [smem:[#allocation30_spill]] }
  0x63   :  { %s2457_s17 = scalar_lea.hbm %s3214_s29, 256 }
  0x64   :  { %p2458_p4 = scmp.ne.s32.totalorder %s3214_s29, %s2457_s17  ;;  %p2461_p5 = scmp.lt.u32.totalorder %s2457_s17, %s3214_s29 }
  0x66   :  { %p2463_p6 = pnand %p2461_p5, %p2458_p4 }
  0x68   :  { %2466 = shalt.err (!%p2463_p6)
}
  0x69   :  { %s2467_s25 = scalar_lea.vmem %s39_s16, 256  ;;  %p2472_p8 = scmp.lt.s32.totalorder %s39_s16, %s39_s16 }
  0x6a   :  { %p2468_p7 = scmp.ne.s32.totalorder %s39_s16, %s2467_s25  ;;  %p2473_p9 = scmp.lt.s32.totalorder %s2467_s25, %s2467_s25 }
  0x6c   :  { %p2474_p10 = por %p2473_p9, %p2472_p8 }
  0x6e   :  { %p2475_p11 = pnand %p2474_p10, %p2468_p7 }
  0x70   :  { %2478 = shalt.err (!%p2475_p11)
}
  0x71   :  { %s2682_s11 = smov 128   ;;  %s2683_s19 = smov 8  }
  0x72   :  { %44 = dma.hbm_to_vmem [thread:$0]  %s3214_s29, 256, %s39_s16, [#allocation3], %s2682_s11, %s2682_s11, %s2683_s19  }
  0x73   :  { %s2684_s22 = smov [#allocation7]   ;;  %s2685_s24 = smov [#allocation10]  }
  0x74   :  { %s62_s20 = sshll.u32 %s2684_s22, 4  ;;  %s88_s30 = sshll.u32 %s2685_s24, 4  ;;  %s63_s20 = int_to_ptr.vmem [resolvable:$true] %s62_s20  ;;  %s89_s30 = int_to_ptr.vmem [resolvable:$true] %s88_s30 }
  0x75   :  { %s3215_s21 = sld [smem:[#allocation32_spill]] }
  0x7b   :  { %s2479_s2 = scalar_lea.hbm %s3215_s21, 1024 }
  0x7c   :  { %p2480_p12 = scmp.ne.s32.totalorder %s3215_s21, %s2479_s2  ;;  %p2483_p13 = scmp.lt.u32.totalorder %s2479_s2, %s3215_s21 }
  0x7e   :  { %p2485_p0 = pnand %p2483_p13, %p2480_p12 }
  0x80   :  { %2488 = shalt.err (!%p2485_p0)
}
  0x81   :  { %s2489_s16 = scalar_lea.vmem %s63_s20, 1024  ;;  %p2494_p2 = scmp.lt.s32.totalorder %s63_s20, %s63_s20 }
  0x82   :  { %p2490_p1 = scmp.ne.s32.totalorder %s63_s20, %s2489_s16  ;;  %p2495_p3 = scmp.lt.s32.totalorder %s2489_s16, %s2489_s16 }
  0x84   :  { %p2496_p4 = por %p2495_p3, %p2494_p2 }
  0x86   :  { %p2497_p5 = pnand %p2496_p4, %p2490_p1 }
  0x88   :  { %2500 = shalt.err (!%p2497_p5)
}
  0x89   :  { %68 = dma.hbm_to_vmem [thread:$0]  %s3215_s21, 1024, %s63_s20, [#allocation6], %s2678_s1, %s2678_s1, %s2679_s28  }
  0x8a   :  { %s2501_s27 = scalar_lea.hbm %s3182_s5, 1024 }
  0x8b   :  { %p2502_p6 = scmp.ne.s32.totalorder %s3182_s5, %s2501_s27  ;;  %p2505_p7 = scmp.lt.u32.totalorder %s2501_s27, %s3182_s5 }
  0x8d   :  { %p2507_p8 = pnand %p2505_p7, %p2502_p6 }
  0x8f   :  { %2510 = shalt.err (!%p2507_p8)
}
  0x90   :  { %s2511_s17 = scalar_lea.vmem %s89_s30, 1024  ;;  %p2516_p10 = scmp.lt.s32.totalorder %s89_s30, %s89_s30 }
  0x91   :  { %p2512_p9 = scmp.ne.s32.totalorder %s89_s30, %s2511_s17  ;;  %p2517_p11 = scmp.lt.s32.totalorder %s2511_s17, %s2511_s17 }
  0x93   :  { %p2518_p12 = por %p2517_p11, %p2516_p10 }
  0x95   :  { %p2519_p13 = pnand %p2518_p12, %p2512_p9 }
  0x97   :  { %2522 = shalt.err (!%p2519_p13)
}
  0x98   :  { %94 = dma.hbm_to_vmem [thread:$0]  %s3182_s5, 1024, %s89_s30, [#allocation9], %s2678_s1, %s2678_s1, %s2679_s28  }
  0x99   :  { %s2686_s21 = smov [#allocation13]   ;;  %s2523_s16 = scalar_lea.hbm %s3186_s9, 4096 }
  0x9a   :  { %s116_s2 = sshll.u32 %s2686_s21, 4  ;;  %p2524_p0 = scmp.ne.s32.totalorder %s3186_s9, %s2523_s16  ;;  %s117_s2 = int_to_ptr.vmem [resolvable:$true] %s116_s2 }
  0x9b   :  { %p2527_p1 = scmp.lt.u32.totalorder %s2523_s16, %s3186_s9 }
  0x9d   :  { %p2529_p2 = pnand %p2527_p1, %p2524_p0 }
  0x9f   :  { %2532 = shalt.err (!%p2529_p2)
}
  0xa0   :  { %s2533_s27 = scalar_lea.vmem %s117_s2, 4096  ;;  %p2538_p4 = scmp.lt.s32.totalorder %s117_s2, %s117_s2 }
  0xa1   :  { %p2534_p3 = scmp.ne.s32.totalorder %s117_s2, %s2533_s27  ;;  %p2539_p5 = scmp.lt.s32.totalorder %s2533_s27, %s2533_s27 }
  0xa3   :  { %p2540_p6 = por %p2539_p5, %p2538_p4 }
  0xa5   :  { %p2541_p7 = pnand %p2540_p6, %p2534_p3 }
  0xa7   :  { %2544 = shalt.err (!%p2541_p7)
}
  0xa8   :  { %s2687_s5 = smov 256   ;;  %s2688_s30 = smov 16  }
  0xa9   :  { %122 = dma.hbm_to_vmem [thread:$0]  %s3186_s9, 4096, %s117_s2, [#allocation12], %s2687_s5, %s2687_s5, %s2688_s30  }
  0xaa   :  { %s2689_s22 = smov [#allocation16]   ;;  %s2545_s0 = scalar_lea.hbm %s3190_s13, 3072 }
  0xab   :  { %s144_s24 = sshll.u32 %s2689_s22, 4  ;;  %p2546_p8 = scmp.ne.s32.totalorder %s3190_s13, %s2545_s0  ;;  %s145_s24 = int_to_ptr.vmem [resolvable:$true] %s144_s24 }
  0xac   :  { %p2549_p9 = scmp.lt.u32.totalorder %s2545_s0, %s3190_s13 }
  0xae   :  { %p2551_p10 = pnand %p2549_p9, %p2546_p8 }
  0xb0   :  { %2554 = shalt.err (!%p2551_p10)
}
  0xb1   :  { %s2555_s29 = scalar_lea.vmem %s145_s24, 3072  ;;  %p2560_p12 = scmp.lt.s32.totalorder %s145_s24, %s145_s24 }
  0xb2   :  { %p2556_p11 = scmp.ne.s32.totalorder %s145_s24, %s2555_s29  ;;  %p2561_p13 = scmp.lt.s32.totalorder %s2555_s29, %s2555_s29 }
  0xb4   :  { %p2562_p0 = por %p2561_p13, %p2560_p12 }
  0xb6   :  { %p2563_p1 = pnand %p2562_p0, %p2556_p11 }
  0xb8   :  { %2566 = shalt.err (!%p2563_p1)
}
  0xb9   :  { %s2690_s9 = smov 192   ;;  %s2691_s2 = smov 12  }
  0xba   :  { %150 = dma.hbm_to_vmem [thread:$0]  %s3190_s13, 3072, %s145_s24, [#allocation15], %s2690_s9, %s2690_s9, %s2691_s2  }
  0xbb   :  { %s2692_s26 = smov [#allocation17]   ;;  %s2567_s3 = scalar_lea.hbm %s3192_s15, 1024 }
  0xbc   :  { %s158_s27 = sshll.u32 %s2692_s26, 4  ;;  %p2568_p2 = scmp.ne.s32.totalorder %s3192_s15, %s2567_s3  ;;  %s159_s27 = int_to_ptr.vmem [resolvable:$true] %s158_s27 }
  0xbd   :  { %p2571_p3 = scmp.lt.u32.totalorder %s2567_s3, %s3192_s15 }
  0xbf   :  { %p2573_p4 = pnand %p2571_p3, %p2568_p2 }
  0xc1   :  { %2576 = shalt.err (!%p2573_p4)
}
  0xc2   :  { %s2577_s0 = scalar_lea.vmem %s159_s27, 1024  ;;  %p2582_p6 = scmp.lt.s32.totalorder %s159_s27, %s159_s27 }
  0xc3   :  { %p2578_p5 = scmp.ne.s32.totalorder %s159_s27, %s2577_s0  ;;  %p2583_p7 = scmp.lt.s32.totalorder %s2577_s0, %s2577_s0 }
  0xc5   :  { %p2584_p8 = por %p2583_p7, %p2582_p6 }
  0xc7   :  { %p2585_p9 = pnand %p2584_p8, %p2578_p5 }
  0xc9   :  { %2588 = shalt.err (!%p2585_p9)
}
  0xca   :  { %164 = dma.hbm_to_vmem [thread:$0]  %s3192_s15, 1024, %s159_s27, [#allocation18], %s2678_s1, %s2678_s1, %s2679_s28  }
  0xcb   :  { %2645 = dma.done.wait [#allocation3], 256  }
  0xcc   :  { %2646 = vsyncadd [#allocation3], 4294967040 }
  0xcd   :  { %2647 = dma.done.wait [#allocation6], 1088  }
  0xce   :  { %2648 = vsyncadd [#allocation6], 4294966208 }
  0xcf   :  { %2649 = dma.done.wait [#allocation9], 2048  }
  0xd0   :  { %2650 = vsyncadd [#allocation9], 4294965248 }
  0xd1   :  { %2651 = dma.done.wait [#allocation12], 6144  }
  0xd2   :  { %2652 = vsyncadd [#allocation12], 4294961152 }
  0xd3   :  { %2653 = dma.done.wait [#allocation15], 5120  }
  0xd4   :  { %2654 = vsyncadd [#allocation15], 4294962176 }
  0xd5   :  { %2655 = dma.done.wait [#allocation18], 1024  }
  0xd6   :  { %2656 = vsyncadd [#allocation18], 4294966272  ;;  %v605_v0 = vlaneseq  ;;  %v2693_v1 = vmov 0.0   ;;  %vm2694_vm0 = vmmov 0   ;;  %v2203_v5 = vld [vmem:[#allocation8] sm:$0xff]   ;;  %v2204_v6 = vld [vmem:[#allocation8 + $0x8] sm:$0xff]  }
  0xd7   :  { %2051 = vmatprep.subr.bf16.mxu0 %v2693_v1  ;;  %2071 = vmatprep.subr.bf16.mxu1 %v2693_v1  ;;  %v2205_v7 = vld [vmem:[#allocation8 + $0x10] sm:$0xff]   ;;  %v2211_v8 = vld [vmem:[#allocation10] sm:$0xff]   ;;  %v2206_v9 = vld [vmem:[#allocation8 + $0x18] sm:$0xff]  }
  0xd8   :  { %v2945_v2 = vand.u32 127, %v605_v0  ;;  %2067 = vmatprep.mubr.msk.bf16.mxu0 %vm2694_vm0, %v2693_v1  ;;  %2087 = vmatprep.mubr.msk.bf16.mxu1 %vm2694_vm0, %v2693_v1  ;;  %v2214_v10 = vld [vmem:[#allocation10 + $0x8] sm:$0xff]   ;;  %v2207_v11 = vld [vmem:[#allocation8 + $0x20] sm:$0xff]   ;;  %v2217_v12 = vld [vmem:[#allocation10 + $0x10] sm:$0xff]  }
  0xd9   :  { %2052 = vmatpush3.bf16.msra.mxu0 %v2203_v5  ;;  %2072 = vmatpush3.bf16.msra.mxu1 %v2211_v8  ;;  %v2208_v13 = vld [vmem:[#allocation8 + $0x28] sm:$0xff]   ;;  %v2220_v14 = vld [vmem:[#allocation10 + $0x18] sm:$0xff]   ;;  %v2209_v15 = vld [vmem:[#allocation8 + $0x30] sm:$0xff]  }
  0xda   :  { %vm607_vm1 = vcmp.eq.s32.totalorder %v2945_v2, 0  ;;  %2053 = vmatprep.subr.bf16.mxu0 %v2693_v1  ;;  %2073 = vmatprep.subr.bf16.mxu1 %v2693_v1  ;;  %v2223_v16 = vld [vmem:[#allocation10 + $0x20] sm:$0xff]   ;;  %v2210_v17 = vld [vmem:[#allocation8 + $0x38] sm:$0xff]   ;;  %v198_v18 = vld [vmem:[#allocation2] sm:$0xff] }
  0xdb   :  { %v2951_v3 = vsel %vm607_vm1, 1.0, %v2693_v1  ;;  %v199_v19 = vld [vmem:[#allocation2 + $0x8] sm:$0xff]  ;;  %v2226_v20 = vld [vmem:[#allocation10 + $0x28] sm:$0xff]   ;;  %v2212_v21 = vld [vmem:[#allocation11 + $0x40] sm:$0xff]  }
  0xdc   :  { %v610_v4 = vpack.c.bf16 %v2951_v3, %v2951_v3   ;;  %v200_v22 = vpack.c.bf16 %v199_v19, %v198_v18  ;;  %v2213_v23 = vld [vmem:[#allocation11] sm:$0xff]   ;;  %v2229_v24 = vld [vmem:[#allocation10 + $0x30] sm:$0xff]   ;;  %v2215_v25 = vld [vmem:[#allocation11 + $0x48] sm:$0xff]  }
  0xdd   :  { %2054 = vmatpush3.bf16.msra.mxu0 %v2204_v6  ;;  %2074 = vmatpush3.bf16.msra.mxu1 %v2214_v10  ;;  %v427_v26 = vld [vmem:[#allocation5 + $0x2] sm:$0x3]  ;;  %v2216_v28 = vld [vmem:[#allocation11 + $0x8] sm:$0xff]   ;;  %v2218_v30 = vld [vmem:[#allocation11 + $0x50] sm:$0xff]  }
  0xde   :  { %2055 = vmatprep.subr.bf16.mxu0 %v2693_v1  ;;  %2075 = vmatprep.subr.bf16.mxu1 %v2693_v1  ;;  %v429_v27 = vpack.c.bf16 %v427_v26, %v427_v26  ;;  %v2232_v29 = vld [vmem:[#allocation10 + $0x38] sm:$0xff]   ;;  %v2219_v31 = vld [vmem:[#allocation11 + $0x10] sm:$0xff]   ;;  %v2224_v34 = vld [vmem:[#allocation11 + $0x60] sm:$0xff]  }
  0xdf   :  { %v2221_v32 = vld [vmem:[#allocation11 + $0x58] sm:$0xff]   ;;  %v2225_v35 = vld [vmem:[#allocation11 + $0x20] sm:$0xff]   ;;  %v2227_v36 = vld [vmem:[#allocation11 + $0x68] sm:$0xff]  }
  0xe0   :  { %v2222_v33 = vld [vmem:[#allocation11 + $0x18] sm:$0xff]   ;;  %v2228_v37 = vld [vmem:[#allocation11 + $0x28] sm:$0xff]   ;;  %v2230_v38 = vld [vmem:[#allocation11 + $0x70] sm:$0xff]  }
  0xe1   :  { %2056 = vmatpush3.bf16.msra.mxu0 %v2205_v7  ;;  %2076 = vmatpush3.bf16.msra.mxu1 %v2217_v12  ;;  %v2231_v39 = vld [vmem:[#allocation11 + $0x30] sm:$0xff]   ;;  %v2233_v40 = vld [vmem:[#allocation11 + $0x78] sm:$0xff]   ;;  %v1832_v44 = vld [vmem:[%s3181_s4] ss:$0 sm:$0xff] }
  0xe2   :  { %2057 = vmatprep.subr.bf16.mxu0 %v2693_v1  ;;  %2077 = vmatprep.subr.bf16.mxu1 %v2693_v1  ;;  %v2234_v41 = vld [vmem:[#allocation11 + $0x38] sm:$0xff]   ;;  %v1841_v51 = vld [vmem:[%s3183_s6] ss:$0 sm:$0xff]  ;;  %s2993_s6 = smov 0  }
  0xe3   :  { %v425_v42 = vld [vmem:[#allocation5] sm:$0x3]  ;;  %v1850_v59 = vld [vmem:[%s3185_s8] ss:$0 sm:$0xff] }
  0xe4   :  { %v428_v43 = vpack.c.bf16 %v425_v42, %v425_v42 }
  0xe5   :  { %2058 = vmatpush3.bf16.msra.mxu0 %v2206_v9  ;;  %2078 = vmatpush3.bf16.msra.mxu1 %v2220_v14 }
  0xe6   :  { %2059 = vmatprep.subr.bf16.mxu0 %v2693_v1  ;;  %2079 = vmatprep.subr.bf16.mxu1 %v2693_v1 }
  0xe9   :  { %2060 = vmatpush3.bf16.msra.mxu0 %v2207_v11  ;;  %2080 = vmatpush3.bf16.msra.mxu1 %v2223_v16 }
  0xea   :  { %2061 = vmatprep.subr.bf16.mxu0 %v2693_v1  ;;  %2081 = vmatprep.subr.bf16.mxu1 %v2693_v1 }
  0xed   :  { %2062 = vmatpush3.bf16.msra.mxu0 %v2208_v13  ;;  %2082 = vmatpush3.bf16.msra.mxu1 %v2226_v20 }
  0xee   :  { %2063 = vmatprep.subr.bf16.mxu0 %v2693_v1  ;;  %2083 = vmatprep.subr.bf16.mxu1 %v2693_v1 }
  0xf1   :  { %2064 = vmatpush3.bf16.msra.mxu0 %v2209_v15  ;;  %2084 = vmatpush3.bf16.msra.mxu1 %v2229_v24 }
  0xf2   :  { %2065 = vmatprep.subr.bf16.mxu0 %v2693_v1  ;;  %2085 = vmatprep.subr.bf16.mxu1 %v2693_v1 }
  0xf5   :  { %2066 = vmatpush3.bf16.msra.mxu0 %v2210_v17  ;;  %2086 = vmatpush3.bf16.msra.mxu1 %v2232_v29 }
  0xf6   :  { %1980 = vmatprep.subr.bf16.mxu0 %v2212_v21 }
  0xf8   :  { %2068 = vmatmul.mubr.bf16.vlgmr.msra.gmra.mrb[0].mxu0 %v200_v22  ;;  %2088 = vmatmul.mubr.bf16.vlgmr.msra.gmra.mrb[0].mxu1 %v200_v22 }
  0xf9   :  { %1981 = vmatpush3.bf16.msra.mxu0 %v2213_v23  ;;  %597 = vmatprep.mubr.bf16.mxu0 %v429_v27 }
  0xfa   :  { %1982 = vmatprep.subr.bf16.mxu0 %v2215_v25 }
  0xfd   :  { %1983 = vmatpush3.bf16.msra.mxu0 %v2216_v28 }
  0xfe   :  { %1984 = vmatprep.subr.bf16.mxu0 %v2218_v30 }
 0x101   :  { %1985 = vmatpush3.bf16.msra.mxu0 %v2219_v31 }
 0x102   :  { %1986 = vmatprep.subr.bf16.mxu0 %v2221_v32 }
 0x105   :  { %1987 = vmatpush3.bf16.msra.mxu0 %v2222_v33 }
 0x106   :  { %1988 = vmatprep.subr.bf16.mxu0 %v2224_v34 }
 0x109   :  { %1989 = vmatpush3.bf16.msra.mxu0 %v2225_v35 }
 0x10a   :  { %1990 = vmatprep.subr.bf16.mxu0 %v2227_v36 }
 0x10d   :  { %1991 = vmatpush3.bf16.msra.mxu0 %v2228_v37 }
 0x10e   :  { %1992 = vmatprep.subr.bf16.mxu0 %v2230_v38 }
 0x111   :  { %1993 = vmatpush3.bf16.msra.mxu0 %v2231_v39 }
 0x112   :  { %1994 = vmatprep.subr.bf16.mxu0 %v2233_v40 }
 0x115   :  { %1995 = vmatpush3.bf16.msra.mxu0 %v2234_v41 }
 0x118   :  { %598 = vmatmul.mubr.bf16.vlgmr.msra.gmra.mrb[4].mxu0 %v428_v43 }
 0x1cb   :  { %v306_v45 = vpop.f32.mrb[0].mxu0  ;;  %v418_v52 = vpop.f32.mrb[0].mxu1 }
 0x1cc   :  { %v2972_v46 = vadd.f32 %v1832_v44, %v306_v45  ;;  %v2069_v47 = vpop.f32.mrb[1].mxu0  ;;  %v2979_v53 = vadd.f32 %v1841_v51, %v418_v52  ;;  %v2089_v54 = vpop.f32.mrb[1].mxu1 }
 0x1cd   :  { %v309_v48 = vpop.f32.mrb[2].mxu0  ;;  %v421_v55 = vpop.f32.mrb[2].mxu1 }
 0x1ce   :  { %v2974_v49 = vadd.f32 %v1832_v44, %v309_v48  ;;  %v2070_v50 = vpop.f32.mrb[3].mxu0  ;;  %v2981_v56 = vadd.f32 %v1841_v51, %v421_v55  ;;  %v2090_v57 = vpop.f32.mrb[3].mxu1 }
 0x1eb   :  { %v1996_v58 = vpop.f32.mrb[4].mxu0 }
 0x1ec   :  { %v1997_v60 = vpop.f32.mrb[5].mxu0 }
 0x1ed   :  { %v1998_v61 = vadd.f32 %v1997_v60, %v1996_v58  ;;  %v1999_v62 = vpop.f32.mrb[6].mxu0 }
 0x1ee   :  { %v2000_v63 = vpop.f32.mrb[7].mxu0 }
 0x1ef   :  { %v600_v1 = vadd.f32 %v1998_v61, %v1850_v59  }
 0x1f0 LB: > { %v2237_v5 = vld [vmem:[#allocation13 + $0x4] ss:$16 sps:$4 sm:$0xff]   ;;  %v2239_v6 = vld [vmem:[#allocation13] ss:$16 sps:$4 sm:$0xff]   ;;  %v2695_v3 = vmov 0   ;;  %v3010_v21 = vpack.c.bf16 %v2667_v1, %v2667_v1  ;;  %v3014_v22 = vshrl.u32 %v605_v0, 7  ;;  %s2671_s6 = sphi %s2993_s6, %s616_s6   ;;  %v2667_v1 = vphi %v600_v1, %v3217_v1   ;;  %v2663_v4 = vphi %v610_v4, %v1775_v4  }
 0x1f1   : > { %866 = vmatprep.mubr.bf16.mxu0 %v2695_v3  ;;  %2236 = vset.pattern.permute.xlu0 %v2695_v3  ;;  %v2240_v7 = vld [vmem:[#allocation13 + $0x24] ss:$16 sps:$4 sm:$0xff]   ;;  %v2242_v8 = vld [vmem:[#allocation13 + $0x20] ss:$16 sps:$4 sm:$0xff]   ;;  %v2696_v23 = vmov 1966171168  }
 0x1f2   : > { %834 = vmatprep.subr.bf16.mxu0 %v2237_v5  ;;  %2235 = vset.pattern.permute.xlu1 %v2695_v3  ;;  %v2243_v9 = vld [vmem:[#allocation13 + $0x44] ss:$16 sps:$4 sm:$0xff]   ;;  %v2245_v10 = vld [vmem:[#allocation13 + $0x40] ss:$16 sps:$4 sm:$0xff]   ;;  %v1022_v24 = vunpack.c.l.s4 %v2696_v23  ;;  %v3017_v25 = vsub.s32 0, %v3014_v22  ;;  %v3035_v44 = vsub.s32 %v2945_v2, %v3014_v22  ;;  %vm1071_vm2 = vcmask 1041409  }
 0x1f3   : > { %835 = vmatpush1.bf16.msra.mxu0 %v2239_v6  ;;  %907 = vmatprep.mubr.bf16.mxu1 %v2695_v3  ;;  %v2246_v11 = vld [vmem:[#allocation13 + $0x64] ss:$16 sps:$4 sm:$0xff]   ;;  %v2248_v12 = vld [vmem:[#allocation13 + $0x60] ss:$16 sps:$4 sm:$0xff]   ;;  %v3022_v26 = vld [vmem:[%s3187_s10] sm:$0xf] }
 0x1f4   : > { %836 = vmatprep.subr.bf16.mxu0 %v2240_v7  ;;  %v2249_v13 = vld [vmem:[#allocation13 + $0x84] ss:$16 sps:$4 sm:$0xff]   ;;  %v2251_v14 = vld [vmem:[#allocation13 + $0x80] ss:$16 sps:$4 sm:$0xff]   ;;  %v1023_v27 = vunpack.c.0.s8 %v1022_v24  ;;  %v657_v28 = vrot.slane %v3022_v26, %v3017_v25  ;;  %vm1074_vm3 = vcmask 58368   ;;  %v3042_v55 = vsub.s32 1, %v3014_v22 }
 0x1f5   : > { %v2252_v15 = vld [vmem:[#allocation13 + $0xa4] ss:$16 sps:$4 sm:$0xff]   ;;  %v2254_v16 = vld [vmem:[#allocation13 + $0xa0] ss:$16 sps:$4 sm:$0xff]   ;;  %vm2698_vm4 = vmmov 0   ;;  %s1960_s16 = sshll.u32 %s2671_s6, 1 }
 0x1f6   : > { %v2255_v17 = vld [vmem:[#allocation13 + $0xc4] ss:$16 sps:$4 sm:$0xff]   ;;  %v2257_v18 = vld [vmem:[#allocation13 + $0xc0] ss:$16 sps:$4 sm:$0xff]   ;;  %v1026_v29 = vsub.s32 %v1023_v27, %v3014_v22  ;;  %v2269_v24 = vld [vmem:[#allocation13 + $0xc] ss:$16 sps:$4 sm:$0xff]   ;;  %s1753_s2 = scalar_lea.vmem %s3195_s18, %s1960_s16 }
 0x1f7   : > { %837 = vmatpush1.bf16.msra.mxu0 %v2242_v8  ;;  %v2258_v19 = vld [vmem:[#allocation13 + $0xe4] ss:$16 sps:$4 sm:$0xff]   ;;  %v2260_v20 = vld [vmem:[#allocation13 + $0xe0] ss:$16 sps:$4 sm:$0xff]   ;;  %v2697_v8 = vmov 0.0   ;;  %875 = vmatprep.subr.bf16.mxu1 %v2269_v24  ;;  %s3216_s3 = sld [smem:[#allocation34_spill]] }
 0x1f8   : > { %838 = vmatprep.subr.bf16.mxu0 %v2243_v9  ;;  %v2261_v7 = vld [vmem:[#allocation7] sm:$0xff]   ;;  %v2262_v9 = vld [vmem:[#allocation7 + $0x8] sm:$0xff]   ;;  %vm1727_vm5 = vcmask 1041408   ;;  %s1741_s7 = scalar_lea.vmem [#allocation19], %s1960_s16  ;;  %s616_s6 = sadd.s32 1, %s2671_s6  }
 0x1f9   : > { %v2271_v27 = vld [vmem:[#allocation13 + $0x8] ss:$16 sps:$4 sm:$0xff]   ;;  %v2327_v24 = vld [vmem:[#allocation16 + $0x64] ss:$12 sps:$4 sm:$0xff]   ;;  %p613_p10 = scmp.ge.s32.totalorder %s616_s6, 50  }
 0x1fa   : > { %876 = vmatpush1.bf16.msra.mxu1 %v2271_v27  ;;  %v2325_v27 = vld [vmem:[#allocation16 + $0x60] ss:$12 sps:$4 sm:$0xff]   ;;  %s2699_s22 = smov (%p613_p10), [#allocation19]   ;;  %s2700_s20 = smov (%p613_p10), [#allocation20]  }
 0x1fb   : > { %839 = vmatpush1.bf16.msra.mxu0 %v2245_v10  ;;  %v2263_v10 = vld [vmem:[#allocation7 + $0x10] sm:$0xff]   ;;  %s1782_s17 = sshll.u32 (%p613_p10), %s2699_s22, 4  ;;  %s1797_s0 = sshll.u32 (%p613_p10), %s2700_s20, 4  ;;  %s1783_s17 = int_to_ptr.vmem [resolvable:$true] %s1782_s17  ;;  %s1798_s0 = int_to_ptr.vmem [resolvable:$true] %s1797_s0 }
 0x1fc   : > { %840 = vmatprep.subr.bf16.mxu0 %v2246_v11  ;;  %v2264_v11 = vld [vmem:[#allocation7 + $0x18] sm:$0xff]   ;;  %s2589_s13 = scalar_lea.vmem (%p613_p10), %s1783_s17, 1600  ;;  %p2594_p12 = scmp.lt.s32.totalorder (%p613_p10), %s1783_s17, %s1783_s17 }
 0x1fd   :  { %p2590_p11 = scmp.ne.s32.totalorder (%p613_p10), %s1783_s17, %s2589_s13  ;;  %p2595_p13 = scmp.lt.s32.totalorder (%p613_p10), %s2589_s13, %s2589_s13 }
 0x1ff   : > { %841 = vmatpush1.bf16.msra.mxu0 %v2248_v12  ;;  %v2265_v12 = vld [vmem:[#allocation7 + $0x20] sm:$0xff]   ;;  %p2596_p0 = por (%p613_p10), %p2595_p13, %p2594_p12 }
 0x200   : > { %842 = vmatprep.subr.bf16.mxu0 %v2249_v13  ;;  %v2266_v13 = vld [vmem:[#allocation7 + $0x28] sm:$0xff]  }
 0x201   :  { %p2597_p1 = pnand (%p613_p10), %p2596_p0, %p2590_p11 }
 0x203   : > { %843 = vmatpush1.bf16.msra.mxu0 %v2251_v14  ;;  %v2267_v14 = vld [vmem:[#allocation7 + $0x30] sm:$0xff]  }
 0x204   : > { %844 = vmatprep.subr.bf16.mxu0 %v2252_v15  ;;  %v2268_v15 = vld [vmem:[#allocation7 + $0x38] sm:$0xff]  }
 0x207   : > { %845 = vmatpush1.bf16.msra.mxu0 %v2254_v16 }
 0x208   : > { %846 = vmatprep.subr.bf16.mxu0 %v2255_v17 }
 0x20b   : > { %847 = vmatpush1.bf16.msra.mxu0 %v2257_v18 }
 0x20c   : > { %848 = vmatprep.subr.bf16.mxu0 %v2258_v19 }
 0x20f   : > { %849 = vmatpush1.bf16.msra.mxu0 %v2260_v20 }
 0x210   : > { %2091 = vmatprep.subr.bf16.mxu0 %v2697_v8 }
 0x212   : > { %867 = vmatmul.mubr.bf16.vlgmr.msra.gmra.mrb[0].mxu0 %v3010_v21 }
 0x213   : > { %2107 = vmatprep.mubr.msk.bf16.mxu0 %vm2698_vm4, %v2697_v8  ;;  %2092 = vmatpush3.bf16.msra.mxu0 %v2261_v7  ;;  %v2305_v7 = vld [vmem:[#allocation14 + $0x70] sm:$0xff]  }
 0x214   : > { %2093 = vmatprep.subr.bf16.mxu0 %v2697_v8 }
 0x217   : > { %2094 = vmatpush3.bf16.msra.mxu0 %v2262_v9 }
 0x218   : > { %2095 = vmatprep.subr.bf16.mxu0 %v2697_v8 }
 0x21b   : > { %2096 = vmatpush3.bf16.msra.mxu0 %v2263_v10  ;;  %v2307_v10 = vld [vmem:[#allocation14 + $0x78] sm:$0xff]  }
 0x21c   : > { %2097 = vmatprep.subr.bf16.mxu0 %v2697_v8 }
 0x21f   : > { %2098 = vmatpush3.bf16.msra.mxu0 %v2264_v11  ;;  %v2308_v11 = vld [vmem:[#allocation14 + $0x38] sm:$0xff]  }
 0x220   : > { %2099 = vmatprep.subr.bf16.mxu0 %v2697_v8 }
 0x223   : > { %2100 = vmatpush3.bf16.msra.mxu0 %v2265_v12 }
 0x224   : > { %2101 = vmatprep.subr.bf16.mxu0 %v2697_v8 }
 0x227   : > { %2102 = vmatpush3.bf16.msra.mxu0 %v2266_v13 }
 0x228   : > { %2103 = vmatprep.subr.bf16.mxu0 %v2697_v8 }
 0x22b   : > { %2104 = vmatpush3.bf16.msra.mxu0 %v2267_v14  ;;  %v2309_v14 = vld [vmem:[#allocation16] ss:$12 sps:$4 sm:$0xff]  }
 0x22c   : > { %2105 = vmatprep.subr.bf16.mxu0 %v2697_v8 }
 0x22f   : > { %2106 = vmatpush3.bf16.msra.mxu0 %v2268_v15  ;;  %v2311_v15 = vld [vmem:[#allocation16 + $0x4] ss:$12 sps:$4 sm:$0xff]  }
 0x230   : > { %1513 = vmatprep.subr.bf16.mxu0 %v2311_v15 }
 0x232   : > { %2108 = vmatmul.mubr.bf16.vlgmr.msra.gmra.mrb[4].mxu0 %v2663_v4  ;;  %v2275_v4 = vld [vmem:[#allocation13 + $0x4c] ss:$16 sps:$4 sm:$0xff]  }
 0x233   : > { %1545 = vmatprep.mubr.bf16.mxu0 %v2695_v3  ;;  %v2277_v3 = vld [vmem:[#allocation13 + $0x48] ss:$16 sps:$4 sm:$0xff]   ;;  %1514 = vmatpush1.bf16.msra.mxu0 %v2309_v14  ;;  %v1908_v14 = vld [vmem:[%s3189_s12] ss:$0 sm:$0xff] }
 0x2e5   : > { %v868_v30 = vpop.f32.mrb[0].mxu0 }
 0x2e6   : > { %v869_v31 = vadd.f32 %v868_v30, %v657_v28  ;;  %v3027_v32 = vpop.f32.mrb[1].mxu0  ;;  %v2272_v28 = vld [vmem:[#allocation13 + $0x2c] ss:$16 sps:$4 sm:$0xff]  }
 0x2e7   : > { %v872_v33 = vpop.f32.mrb[2].mxu0  ;;  %877 = vmatprep.subr.bf16.mxu1 %v2272_v28  ;;  %v2278_v30 = vld [vmem:[#allocation13 + $0x6c] ss:$16 sps:$4 sm:$0xff]  }
 0x2e8   : > { %v1027_v34 = vrot.slane %v869_v31, %v1026_v29  ;;  %v873_v35 = vpop.f32.mrb[3].mxu0  ;;  %v2280_v31 = vld [vmem:[#allocation13 + $0x68] ss:$16 sps:$4 sm:$0xff]   ;;  %v2281_v33 = vld [vmem:[#allocation13 + $0x8c] ss:$16 sps:$4 sm:$0xff]  }
 0x2e9   : > { %v2284_v35 = vld [vmem:[#allocation13 + $0xac] ss:$16 sps:$4 sm:$0xff]  }
 0x2ea   : > { %v1028_v36 = vcombine.high %v1027_v34, %v1027_v34  ;;  %v1035_v37 = vrot.slane %v1027_v34, %v1026_v29  ;;  %v2283_v34 = vld [vmem:[#allocation13 + $0x88] ss:$16 sps:$4 sm:$0xff]  }
 0x2eb   : > { %v2331_v28 = vld [vmem:[#allocation16 + $0x7c] ss:$12 sps:$4 sm:$0xff]  }
 0x2ec   : > { %v1046_v38 = vrot.slane %v1035_v37, %v3017_v25  ;;  %v1042_v39 = vrot.slane %v1028_v36, %v1026_v29  ;;  %v2274_v29 = vld [vmem:[#allocation13 + $0x28] ss:$16 sps:$4 sm:$0xff]   ;;  %v2287_v37 = vld [vmem:[#allocation13 + $0xcc] ss:$16 sps:$4 sm:$0xff]  }
 0x2ed   : > { %878 = vmatpush1.bf16.msra.mxu1 %v2274_v29  ;;  %v2286_v36 = vld [vmem:[#allocation13 + $0xa8] ss:$16 sps:$4 sm:$0xff]  }
 0x2ee   : > { %v1053_v40 = vmul.f32 %v1046_v38, %v2972_v46  ;;  %v1050_v41 = vrot.slane %v1042_v39, %v3017_v25  ;;  %879 = vmatprep.subr.bf16.mxu1 %v2275_v4  ;;  %v2289_v38 = vld [vmem:[#allocation13 + $0xc8] ss:$16 sps:$4 sm:$0xff]   ;;  %v2290_v39 = vld [vmem:[#allocation13 + $0xec] ss:$16 sps:$4 sm:$0xff]  }
 0x2ef   : > { %v2329_v29 = vld [vmem:[#allocation16 + $0x78] ss:$12 sps:$4 sm:$0xff]  }
 0x2f0   : > { %1055 = vadd.xlane.f32.xlu0 %v1053_v40  ;;  %v1054_v42 = vmul.f32 %v1050_v41, %v2974_v49  ;;  %v2292_v40 = vld [vmem:[#allocation13 + $0xe8] ss:$16 sps:$4 sm:$0xff]   ;;  %v2293_v41 = vld [vmem:[#allocation14 + $0x40] sm:$0xff]  }
 0x2f1   : > { %880 = vmatpush1.bf16.msra.mxu1 %v2277_v3 }
 0x2f2   : > { %881 = vmatprep.subr.bf16.mxu1 %v2278_v30 }
 0x2f4   : > { %1057 = vadd.xlane.f32.xlu0 %v1054_v42  ;;  %v2294_v42 = vld [vmem:[#allocation14] sm:$0xff]  }
 0x2f5   : > { %882 = vmatpush1.bf16.msra.mxu1 %v2280_v31 }
 0x2f6   : > { %883 = vmatprep.subr.bf16.mxu1 %v2281_v33 }
 0x2f9   : > { %884 = vmatpush1.bf16.msra.mxu1 %v2283_v34 }
 0x2fa   : > { %885 = vmatprep.subr.bf16.mxu1 %v2284_v35 }
 0x2fd   : > { %886 = vmatpush1.bf16.msra.mxu1 %v2286_v36 }
 0x2fe   : > { %887 = vmatprep.subr.bf16.mxu1 %v2287_v37 }
 0x301   : > { %888 = vmatpush1.bf16.msra.mxu1 %v2289_v38 }
 0x302   : > { %889 = vmatprep.subr.bf16.mxu1 %v2290_v39 }
 0x305   : > { %890 = vmatpush1.bf16.msra.mxu1 %v2292_v40  ;;  %v3073_v9 = vpop.f32.mrb[4].mxu0 }
 0x306   : > { %2011 = vmatprep.subr.bf16.mxu1 %v2293_v41 }
 0x308   : > { %908 = vmatmul.mubr.bf16.vlgmr.msra.gmra.mrb[0].mxu1 %v3010_v21  ;;  %v2300_v21 = vld [vmem:[#allocation14 + $0x18] sm:$0xff]  }
 0x309   : > { %2012 = vmatpush3.bf16.msra.mxu1 %v2294_v42 }
 0x37d   : > { %v1056_v43 = vpop.xlane.xlu0 %1055 }
 0x37e   : > { %v1059_v45 = vmul.f32 0.17677669, %v1056_v43  ;;  %v2295_v43 = vld [vmem:[#allocation14 + $0x48] sm:$0xff]  }
 0x37f   : > { %2013 = vmatprep.subr.bf16.mxu1 %v2295_v43 }
 0x380   : > { %v1066_v50 = vrot.slane %v1059_v45, %v3035_v44 }
 0x381   : > { %v1058_v47 = vpop.xlane.xlu0 %1057 }
 0x382   : > { %v1060_v48 = vmul.f32 0.17677669, %v1058_v47  ;;  %v2297_v47 = vld [vmem:[#allocation14 + $0x50] sm:$0xff]  }
 0x384   : > { %v1070_v51 = vrot.slane %v1060_v48, %v3035_v44 }
 0x386   : > { %v1072_v52 = vsel %vm1071_vm2, %v1070_v51, %v1066_v50 }
 0x387   : > { %v1075_v54 = vsel %vm1074_vm3, %v1072_v52, -inf }
 0x388   : > { %1076 = vmax.xlane.f32.xlu1 %v1075_v54 }
 0x3db   : > { %v3076_v4 = vpop.f32.mrb[0].mxu1 }
 0x3dc   : > { %v3078_v3 = vpop.f32.mrb[1].mxu1 }
 0x3dd   : > { %v913_v30 = vpop.f32.mrb[2].mxu1 }
 0x3de   : > { %v914_v31 = vpop.f32.mrb[3].mxu1  ;;  %v2346_v30 = vld [vmem:[#allocation17 + $0x28] sm:$0xff]  }
 0x3df   : > { %v2347_v31 = vld [vmem:[#allocation17 + $0x30] sm:$0xff]  }
 0x415   : > { %v1077_v57 = vpop.xlane.xlu1 %1076 }
 0x416   : > { %v1082_v58 = vrot.slane %v1077_v57, %v3017_v25  ;;  %v1086_v59 = vrot.slane %v1077_v57, %v3042_v55 }
 0x418   : > { %v1089_v60 = vsub.f32 %v1059_v45, %v1082_v58  ;;  %v1090_v61 = vsub.f32 %v1060_v48, %v1086_v59  ;;  %v2296_v45 = vld [vmem:[#allocation14 + $0x8] sm:$0xff]   ;;  %v2298_v48 = vld [vmem:[#allocation14 + $0x10] sm:$0xff]   ;;  %v2299_v58 = vld [vmem:[#allocation14 + $0x58] sm:$0xff]  }
 0x419   : > { %2014 = vmatpush3.bf16.msra.mxu1 %v2296_v45 }
 0x41a   : > { %v1091_v62 = vmul.f32 1.442695, %v1089_v60  ;;  %v1093_v63 = vmul.f32 1.442695, %v1090_v61  ;;  %2015 = vmatprep.subr.bf16.mxu1 %v2297_v47  ;;  %v2301_v60 = vld [vmem:[#allocation14 + $0x60] sm:$0xff]  }
 0x41b   : > { %v2302_v61 = vld [vmem:[#allocation14 + $0x20] sm:$0xff]  }
 0x41c   : > { %2349 = vpow2.f32 %v1091_v62  ;;  %v2303_v62 = vld [vmem:[#allocation14 + $0x68] sm:$0xff]  }
 0x41d   : > { %2351 = vpow2.f32 %v1093_v63  ;;  %2016 = vmatpush3.bf16.msra.mxu1 %v2298_v48  ;;  %v2304_v63 = vld [vmem:[#allocation14 + $0x28] sm:$0xff]  }
 0x41e   : > { %2017 = vmatprep.subr.bf16.mxu1 %v2299_v58  ;;  %v1158_v58 = vpack.c.bf16 %v3073_v9, %v3073_v9  ;;  %v2333_v9 = vld [vmem:[#allocation16 + $0x90] ss:$12 sps:$4 sm:$0xff]  }
 0x421   : > { %2018 = vmatpush3.bf16.msra.mxu1 %v2300_v21 }
 0x422   : > { %2019 = vmatprep.subr.bf16.mxu1 %v2301_v60  ;;  %v2316_v60 = vld [vmem:[#allocation16 + $0x20] ss:$12 sps:$4 sm:$0xff]  }
 0x425   : > { %2020 = vmatpush3.bf16.msra.mxu1 %v2302_v61  ;;  %v2320_v61 = vld [vmem:[#allocation16 + $0x38] ss:$12 sps:$4 sm:$0xff]  }
 0x426   : > { %v3046_v5 = vpop.eup %2349  ;;  %2021 = vmatprep.subr.bf16.mxu1 %v2303_v62  ;;  %v2324_v62 = vld [vmem:[#allocation16 + $0x50] ss:$12 sps:$4 sm:$0xff]  }
 0x427   : > { %v3048_v6 = vpop.eup %2351  ;;  %1098 = vperm.xlu1 %2235, %v3046_v5  }
 0x428   : > { %1101 = vperm.xlu0 %2236, %v3048_v6  }
 0x429   : > { %2022 = vmatpush3.bf16.msra.mxu1 %v2304_v63  ;;  %v2328_v63 = vld [vmem:[#allocation16 + $0x68] ss:$12 sps:$4 sm:$0xff]  }
 0x42a   : > { %2023 = vmatprep.subr.bf16.mxu1 %v2305_v7  ;;  %v2332_v7 = vld [vmem:[#allocation16 + $0x80] ss:$12 sps:$4 sm:$0xff]  }
 0x4a6   : > { %v1099_v16 = vpop.permute.xlu1 %1098 }
 0x4a7   : > { %v1102_v17 = vpop.permute.xlu0 %1101  ;;  %v1106_v18 = vrot.slane %v1099_v16, %v3035_v44  ;;  %v2315_v16 = vld [vmem:[#allocation16 + $0x1c] ss:$12 sps:$4 sm:$0xff]  }
 0x4a8   : > { %v1110_v19 = vrot.slane %v1102_v17, %v3035_v44  ;;  %v2313_v17 = vld [vmem:[#allocation16 + $0x18] ss:$12 sps:$4 sm:$0xff]   ;;  %1515 = vmatprep.subr.bf16.mxu0 %v2315_v16 }
 0x4a9   : > { %1516 = vmatpush1.bf16.msra.mxu0 %v2313_v17 }
 0x4aa   : > { %v1111_v20 = vsel %vm1071_vm2, %v1110_v19, %v1106_v18  ;;  %v2319_v18 = vld [vmem:[#allocation16 + $0x34] ss:$12 sps:$4 sm:$0xff]   ;;  %v2317_v19 = vld [vmem:[#allocation16 + $0x30] ss:$12 sps:$4 sm:$0xff]  }
 0x4ab   : > { %v1113_v23 = vsel %vm1074_vm3, %v1111_v20, 0.0  ;;  %1517 = vmatprep.subr.bf16.mxu0 %v2319_v18  ;;  %v2323_v20 = vld [vmem:[#allocation16 + $0x4c] ss:$12 sps:$4 sm:$0xff]  }
 0x4ac   : > { %1114 = vadd.xlane.f32.xlu1 %v1113_v23  ;;  %v2321_v23 = vld [vmem:[#allocation16 + $0x48] ss:$12 sps:$4 sm:$0xff]  }
 0x4ad   : > { %1518 = vmatpush1.bf16.msra.mxu0 %v2317_v19 }
 0x4ae   : > { %1519 = vmatprep.subr.bf16.mxu0 %v2323_v20 }
 0x4b1   : > { %1520 = vmatpush1.bf16.msra.mxu0 %v2321_v23  ;;  %v2341_v23 = vld [vmem:[#allocation17] sm:$0xff]  }
 0x4b2   : > { %1521 = vmatprep.subr.bf16.mxu0 %v2327_v24  ;;  %v2342_v24 = vld [vmem:[#allocation17 + $0x8] sm:$0xff]  }
 0x4b5   : > { %1522 = vmatpush1.bf16.msra.mxu0 %v2325_v27  ;;  %v2343_v27 = vld [vmem:[#allocation17 + $0x10] sm:$0xff]  }
 0x4b6   : > { %1523 = vmatprep.subr.bf16.mxu0 %v2331_v28  ;;  %v2344_v28 = vld [vmem:[#allocation17 + $0x18] sm:$0xff]  }
 0x4b9   : > { %1524 = vmatpush1.bf16.msra.mxu0 %v2329_v29  ;;  %v2345_v29 = vld [vmem:[#allocation17 + $0x20] sm:$0xff]  }
 0x539   : > { %v1115_v50 = vpop.xlane.xlu1 %1114 }
 0x53a   : > { %2353 = vrcp.f32 %v1115_v50 }
 0x544   : > { %v2354_v51 = vpop.eup %2353 }
 0x545   : > { %v1121_v52 = vrot.slane %v2354_v51, %v3017_v25  ;;  %v1125_v57 = vrot.slane %v2354_v51, %v3042_v55 }
 0x547   : > { %v1128_v54 = vmul.f32 %v3046_v5, %v1121_v52  ;;  %v1129_v59 = vmul.f32 %v3048_v6, %v1125_v57  ;;  %v2306_v5 = vld [vmem:[#allocation14 + $0x30] sm:$0xff]   ;;  %v2109_v6 = vpop.f32.mrb[5].mxu0 }
 0x548   : > { %2024 = vmatpush3.bf16.msra.mxu1 %v2306_v5  ;;  %v1017_v12 = vpop.f32.mrb[6].mxu0  ;;  %v2335_v5 = vld [vmem:[#allocation16 + $0x94] ss:$12 sps:$4 sm:$0xff]  }
 0x549   : > { %1132 = vperm.xlu0 %2236, %v1128_v54   ;;  %2025 = vmatprep.subr.bf16.mxu1 %v2307_v10  ;;  %v2110_v13 = vpop.f32.mrb[7].mxu0  ;;  %v2336_v10 = vld [vmem:[#allocation16 + $0x98] ss:$12 sps:$4 sm:$0xff]   ;;  %v2337_v6 = vld [vmem:[#allocation16 + $0xa8] ss:$12 sps:$4 sm:$0xff]  }
 0x54a   : > { %1525 = vmatprep.subr.bf16.mxu0 %v2335_v5  ;;  %v2340_v12 = vld [vmem:[#allocation16 + $0xb0] ss:$12 sps:$4 sm:$0xff]  }
 0x54b   : > { %1526 = vmatpush1.bf16.msra.mxu0 %v2333_v9 }
 0x54c   : > { %2026 = vmatpush3.bf16.msra.mxu1 %v2308_v11  ;;  %v2339_v11 = vld [vmem:[#allocation16 + $0xac] ss:$12 sps:$4 sm:$0xff]  }
 0x54d   : > { %1137 = vperm.xlu0 %2236, %v1129_v59   ;;  %2111 = vmatprep.subr.bf16.mxu1 %v2697_v8  ;;  %v2312_v59 = vld [vmem:[#allocation16 + $0x8] ss:$12 sps:$4 sm:$0xff]  }
 0x54e   : > { %1527 = vmatprep.subr.bf16.mxu0 %v2339_v11 }
 0x54f   : > { %1528 = vmatpush1.bf16.msra.mxu0 %v2337_v6 }
 0x550   : > { %2131 = vmatprep.subr.bf16.mxu0 %v2697_v8 }
 0x5c8   : > { %v1133_v33 = vpop.permute.xlu0 %1132 }
 0x5c9   : > { %v1140_v34 = vmul.f32 %v1133_v33, %v2979_v53  ;;  %v1746_v38 = vrot.slane %v1133_v33, %v3035_v44  ;;  %v2348_v33 = vld [vmem:[#allocation17 + $0x38] sm:$0xff]  }
 0x5cb   : > { %v1142_v35 = vrot.slane %v1140_v34, 4 }
 0x5cc   : > { %v1138_v36 = vpop.permute.xlu0 %1137 }
 0x5cd   : > { %v1143_v37 = vadd.f32 %v1142_v35, %v1140_v34  ;;  %v1141_v39 = vmul.f32 %v1138_v36, %v2981_v56  ;;  %v1750_v40 = vrot.slane %v1138_v36, %v3035_v44  ;;  %v664_v34 = vsub.s32 2, %v3014_v22  ;;  %v1368_v35 = vld [vmem:[%s3191_s14] sm:$0x7] }
 0x5ce   : > { %v661_v36 = vrot.slane %v3022_v26, %v3042_v55 }
 0x5cf   : > { %v1144_v41 = vrot.slane %v1143_v37, 2  ;;  %v1148_v42 = vrot.slane %v1141_v39, 4  ;;  %v1751_v43 = vsel %vm1071_vm2, %v1750_v40, %v1746_v38  ;;  %v665_v38 = vrot.slane %v3022_v26, %v664_v34 }
 0x5d0   : > { %1754 = vst.msk [vmem:[%s1753_s2] sm:$0x3] %vm1074_vm3, %v1751_v43 }
 0x5d1   : > { %v1145_v45 = vadd.f32 %v1144_v41, %v1143_v37  ;;  %v1149_v47 = vadd.f32 %v1148_v42, %v1141_v39  ;;  %v1373_v37 = vrot.slane %v1368_v35, %v3017_v25  ;;  %v1377_v39 = vrot.slane %v1368_v35, %v3042_v55 }
 0x5d2   : > { %v871_v42 = vadd.f32 %v3027_v32, %v661_v36  ;;  %v668_v32 = vsub.s32 3, %v3014_v22 }
 0x5d3   : > { %v1150_v48 = vrot.slane %v1149_v47, 2  ;;  %v1146_v50 = vrot.slane %v1145_v45, 1 }
 0x5d5   : > { %v1151_v51 = vadd.f32 %v1150_v48, %v1149_v47  ;;  %v1147_v54 = vadd.f32 %v1146_v50, %v1145_v45  ;;  %v910_v48 = vadd.f32 %v3076_v4, %v665_v38  ;;  %v1381_v4 = vrot.slane %v1368_v35, %v664_v34 }
 0x5d7   : > { %v1152_v52 = vrot.slane %v1151_v51, 1 }
 0x5d9   : > { %v1153_v57 = vadd.f32 %v1152_v52, %v1151_v51 }
 0x5db   : > { %v1156_v21 = vsel %vm1071_vm2, %v1153_v57, %v1147_v54 }
 0x5dc   : > { %v1159_v44 = vpack.c.bf16 %v1156_v21, %v1156_v21 }
 0x5de   : > { %1327 = vmatprep.mubr.bf16.mxu1 %v1159_v44 }
 0x5df   : > { %1328 = vmatmul.mubr.bf16.vlgmr.msra.gmra.mrb[4].mxu1 %v1158_v58 }
 0x5e0   : > { %2112 = vmatpush3.bf16.msra.mxu1 %v2312_v59  ;;  %2127 = vmatprep.mubr.msk.bf16.mxu1 %vm2698_vm4, %v2697_v8 }
 0x5e1   : > { %2113 = vmatprep.subr.bf16.mxu1 %v2697_v8 }
 0x5e4   : > { %2114 = vmatpush3.bf16.msra.mxu1 %v2316_v60 }
 0x5e5   : > { %2115 = vmatprep.subr.bf16.mxu1 %v2697_v8 }
 0x5e8   : > { %2116 = vmatpush3.bf16.msra.mxu1 %v2320_v61  ;;  %v669_v61 = vrot.slane %v3022_v26, %v668_v32  ;;  %v1951_v26 = vld [vmem:[%s3216_s3] ss:$0 sm:$0xff] }
 0x5e9   : > { %2117 = vmatprep.subr.bf16.mxu1 %v2697_v8 }
 0x5ec   : > { %2118 = vmatpush3.bf16.msra.mxu1 %v2324_v62 }
 0x5ed   : > { %2119 = vmatprep.subr.bf16.mxu1 %v2697_v8 }
 0x5f0   : > { %2120 = vmatpush3.bf16.msra.mxu1 %v2328_v63  ;;  %v912_v63 = vadd.f32 %v3078_v3, %v669_v61 }
 0x5f1   : > { %2121 = vmatprep.subr.bf16.mxu1 %v2697_v8 }
 0x5f4   : > { %2122 = vmatpush3.bf16.msra.mxu1 %v2332_v7 }
 0x5f5   : > { %2123 = vmatprep.subr.bf16.mxu1 %v2697_v8 }
 0x5f8   : > { %2124 = vmatpush3.bf16.msra.mxu1 %v2336_v10 }
 0x5f9   : > { %2125 = vmatprep.subr.bf16.mxu1 %v2697_v8 }
 0x5fc   : > { %2126 = vmatpush3.bf16.msra.mxu1 %v2340_v12 }
 0x6b2   : > { %v2027_v13 = vpop.f32.mrb[4].mxu1 }
 0x6b3   : > { %v2028_v15 = vpop.f32.mrb[5].mxu1 }
 0x6b4   : > { %v2029_v16 = vadd.f32 %v2028_v15, %v2027_v13  ;;  %v2030_v17 = vpop.f32.mrb[6].mxu1 }
 0x6b5   : > { %v2031_v18 = vpop.f32.mrb[7].mxu1 }
 0x6b6   : > { %v1330_v19 = vadd.f32 %v2029_v16, %v1908_v14 }
 0x6b8   : > { %v1335_v20 = vpack.c.bf16 %v1330_v19, %v1330_v19 }
 0x6ba   : > { %1546 = vmatmul.mubr.bf16.vlgmr.msra.gmra.mrb[8].mxu0 %v1335_v20  ;;  %2128 = vmatmul.mubr.bf16.vlgmr.msra.gmra.mrb[8].mxu1 %v1335_v20 }
 0x6bb   : > { %2147 = vmatprep.mubr.msk.bf16.mxu0 %vm2698_vm4, %v2697_v8  ;;  %2132 = vmatpush3.bf16.msra.mxu0 %v2341_v23 }
 0x6bc   : > { %2133 = vmatprep.subr.bf16.mxu0 %v2697_v8 }
 0x6bf   : > { %2134 = vmatpush3.bf16.msra.mxu0 %v2342_v24 }
 0x6c0   : > { %2135 = vmatprep.subr.bf16.mxu0 %v2697_v8 }
 0x6c3   : > { %2136 = vmatpush3.bf16.msra.mxu0 %v2343_v27 }
 0x6c4   : > { %2137 = vmatprep.subr.bf16.mxu0 %v2697_v8 }
 0x6c7   : > { %2138 = vmatpush3.bf16.msra.mxu0 %v2344_v28 }
 0x6c8   : > { %2139 = vmatprep.subr.bf16.mxu0 %v2697_v8 }
 0x6cb   : > { %2140 = vmatpush3.bf16.msra.mxu0 %v2345_v29 }
 0x6cc   : > { %2141 = vmatprep.subr.bf16.mxu0 %v2697_v8 }
 0x6cf   : > { %2142 = vmatpush3.bf16.msra.mxu0 %v2346_v30 }
 0x6d0   : > { %2143 = vmatprep.subr.bf16.mxu0 %v2697_v8 }
 0x6d3   : > { %2144 = vmatpush3.bf16.msra.mxu0 %v2347_v31 }
 0x6d4   : > { %2145 = vmatprep.subr.bf16.mxu0 %v2697_v8 }
 0x6d7   : > { %2146 = vmatpush3.bf16.msra.mxu0 %v2348_v33 }
 0x78d   : > { %v1547_v40 = vpop.f32.mrb[8].mxu0  ;;  %v1588_v41 = vpop.f32.mrb[8].mxu1 }
 0x78e   : > { %v1548_v43 = vadd.f32 %v1547_v40, %v1373_v37  ;;  %v1549_v45 = vpop.f32.mrb[9].mxu0  ;;  %v2129_v47 = vpop.f32.mrb[9].mxu1  ;;  %v1589_v5 = vadd.f32 %v1588_v41, %v1381_v4 }
 0x78f   : > { %v1550_v50 = vadd.f32 %v1549_v45, %v1377_v39  ;;  %v1551_v51 = vpop.f32.mrb[10].mxu0  ;;  %v1591_v52 = vpop.f32.mrb[10].mxu1 }
 0x790   : > { %v1594_v54 = vadd.f32 %v1548_v43, %v871_v42  ;;  %v1552_v57 = vpop.f32.mrb[11].mxu0  ;;  %v2130_v58 = vpop.f32.mrb[11].mxu1 }
 0x791   : > { %v1601_v25 = vadd.f32 %v1550_v50, %v910_v48 }
 0x792   : > { %v1949_v21 = vmul.f32 -1.442695, %v1594_v54 }
 0x793   : > { %v1950_v44 = vmul.f32 -1.442695, %v1601_v25 }
 0x794   : > { %2355 = vpow2.f32 %v1949_v21 }
 0x795   : > { %2357 = vpow2.f32 %v1950_v44 }
 0x79e   : > { %v2356_v55 = vpop.eup %2355 }
 0x79f   : > { %v1598_v59 = vadd.f32 1.0, %v2356_v55  ;;  %v2358_v60 = vpop.eup %2357 }
 0x7a0   : > { %v1605_v62 = vadd.f32 1.0, %v2358_v60 }
 0x7a1   : > { %2359 = vrcp.f32 %v1598_v59 }
 0x7a2   : > { %2361 = vrcp.f32 %v1605_v62 }
 0x7ab   : > { %v2360_v7 = vpop.eup %2359 }
 0x7ac   : > { %v1608_v9 = vmul.f32 %v2360_v7, %v912_v63  ;;  %v2362_v11 = vpop.eup %2361 }
 0x7ad   : > { %v1611_v6 = vsub.f32 1.0, %v2362_v11  ;;  %v1613_v14 = vmul.f32 %v2667_v1, %v2362_v11 }
 0x7ae   : > { %v1609_v10 = vadd.f32 %v1608_v9, %v1589_v5 }
 0x7b0   : > { %2363 = vtanh.f32 %v1609_v10 }
 0x7ba   : > { %v2364_v12 = vpop.eup %2363 }
 0x7bb   : > { %v1612_v13 = vmul.f32 %v2364_v12, %v1611_v6 }
 0x7bd   : > { %v1614_v22 = vadd.f32 %v1613_v14, %v1612_v13  }
 0x7bf   : > { %v1615_v15 = vpack.c.bf16 %v1614_v22, %v1614_v22  ;;  %1776 = vst [vmem:[#allocation20] sm:$0x3] (%p613_p10), %v1614_v22 }
 0x7c1   : > { %2148 = vmatmul.mubr.bf16.vlgmr.msra.gmra.mrb[12].mxu0 %v1615_v15 }
 0x894   : > { %v1721_v3 = vpop.f32.mrb[12].mxu0 }
 0x895   : > { %v1722_v16 = vadd.f32 %v1951_v26, %v1721_v3  ;;  %v2149_v17 = vpop.f32.mrb[13].mxu0 }
 0x896   : > { %v1724_v18 = vpop.f32.mrb[14].mxu0 }
 0x897   : > { %v2150_v19 = vpop.f32.mrb[15].mxu0  ;;  %v1728_v20 = vsel %vm1727_vm5, %v1722_v16, -inf }
 0x898   : > { %1729 = vmax.xlane.f32.xlu1 %v1728_v20 }
 0x925   : > { %v1730_v23 = vpop.xlane.xlu1 %1729 }
 0x926   : > { %v1731_v24 = vsub.f32 %v1722_v16, %v1730_v23  ;;  %vm1755_vm6 = vcmp.ge.f32.partialorder %v1722_v16, %v1730_v23 }
 0x927   : > { %v1756_v1 = vsel %vm1755_vm6, %v2945_v2, 128 }
 0x928   : > { %v1732_v27 = vmul.f32 1.442695, %v1731_v24  ;;  %v1757_v28 = vsel %vm1727_vm5, %v1756_v1, 2147483647  ;;  %v3217_v1 = vmov %v1614_v22 }
 0x929   : > { %v1759_v29 = vshra.s32 %v1757_v28, 16  ;;  %v1758_v34 = vand.u32 65535, %v1757_v28 }
 0x92a   : > { %2365 = vpow2.f32 %v1732_v27 }
 0x92b   : > { %v1761_v30 = vcvt.s32.f32 %v1759_v29  ;;  %v1760_v36 = vcvt.s32.f32 %v1758_v34 }
 0x92d   : > { %1762 = vmin.xlane.f32.xlu0 %v1761_v30 }
 0x934   : > { %v2366_v31 = vpop.eup %2365 }
 0x935   : > { %v1734_v33 = vsel %vm1727_vm5, %v2366_v31, 0.0 }
 0x936   : > { %1735 = vadd.xlane.f32.xlu1 %v1734_v33 }
 0x9ba   : > { %v1763_v35 = vpop.xlane.xlu0 %1762 }
 0x9bb   : > { %vm1764_vm7 = vcmp.eq.f32.partialorder %v1761_v30, %v1763_v35  ;;  %v1769_v42 = vcvt.f32.s32 %v1763_v35 }
 0x9bc   : > { %v1765_v37 = vsel %vm1764_vm7, %v1760_v36, inf }
 0x9bd   : > { %1766 = vmin.xlane.f32.xlu1 %v1765_v37  ;;  %v1770_v45 = vshll.u32 %v1769_v42, 16 }
 0x9c3   : > { %v1736_v38 = vpop.xlane.xlu1 %1735 }
 0x9c4   : > { %2367 = vlog2.f32 %v1736_v38 }
 0x9ce   : > { %v2368_v39 = vpop.eup %2367 }
 0x9cf   : > { %v1738_v40 = vmul.f32 0.6931472, %v2368_v39 }
 0x9d1   : > { %v1739_v41 = vsub.f32 %v1731_v24, %v1738_v40 }
 0x9d3   : > { %1742 = vst [vmem:[%s1741_s7] sm:$0x3] %v1739_v41 }
 0xa4a   : > { %v1767_v43 = vpop.xlane.xlu1 %1766 }
 0xa4b   : > { %v1768_v47 = vcvt.f32.s32 %v1767_v43  ;;  %615 = sbr.rel (!%p613_p10) target bundleno = 496 (0x1f0), region = 154 }
 0xa4d   : > { %v1771_v48 = vadd.s32 %v1770_v45, %v1768_v47 }
 0xa4f   : > { %vm1772_vm8 = vcmp.eq.s32.totalorder %v2945_v2, %v1771_v48 }
 0xa50   : > { %v1961_v50 = vsel %vm1772_vm8, 1.0, %v2697_v8 }
 0xa51   : > { %v1775_v4 = vpack.c.bf16 %v1961_v50, %v1961_v50  }
 0xa52   :  { %2600 = shalt.err (!%p2597_p1)
}
 0xa53   :  { %s3218_s1 = sld [smem:[#allocation35_spill]] }
 0xa59   :  { %s2601_s28 = scalar_lea.hbm %s3218_s1, 1600 }
 0xa5a   :  { %p2602_p2 = scmp.ne.s32.totalorder %s3218_s1, %s2601_s28  ;;  %p2605_p3 = scmp.lt.u32.totalorder %s2601_s28, %s3218_s1 }
 0xa5c   :  { %p2607_p4 = pnand %p2605_p3, %p2602_p2 }
 0xa5e   :  { %2610 = shalt.err (!%p2607_p4)
}
 0xa5f   :  { %s3219_s14 = smov 2   ;;  %s3220_s18 = smov 32  }
 0xa60   :  { %1788 = dma.vmem_to_hbm [thread:$0]  %s1783_s17, 1600, %s3218_s1, [#allocation4], %s3220_s18, %s3220_s18, %s3219_s14  }
 0xa61   :  { %s2611_s8 = scalar_lea.vmem %s1798_s0, 32  ;;  %p2616_p6 = scmp.lt.s32.totalorder %s1798_s0, %s1798_s0 }
 0xa62   :  { %p2612_p5 = scmp.ne.s32.totalorder %s1798_s0, %s2611_s8  ;;  %p2617_p7 = scmp.lt.s32.totalorder %s2611_s8, %s2611_s8 }
 0xa64   :  { %p2618_p8 = por %p2617_p7, %p2616_p6 }
 0xa66   :  { %p2619_p9 = pnand %p2618_p8, %p2612_p5 }
 0xa68   :  { %2622 = shalt.err (!%p2619_p9)
}
 0xa69   :  { %s3221_s29 = sld [smem:[#allocation36_spill]] }
 0xa6f   :  { %s2623_s9 = scalar_lea.hbm %s3221_s29, 32 }
 0xa70   :  { %p2624_p10 = scmp.ne.s32.totalorder %s3221_s29, %s2623_s9  ;;  %p2627_p11 = scmp.lt.u32.totalorder %s2623_s9, %s3221_s29 }
 0xa72   :  { %p2629_p12 = pnand %p2627_p11, %p2624_p10 }
 0xa74   :  { %2632 = shalt.err (!%p2629_p12)
}
 0xa75   :  { %1800 = dma.vmem_to_hbm [thread:$0]  %s1798_s0, 32, %s3221_s29, [#allocation21]  }
 0xa76   :  { %2657 = dma.done.wait [#allocation4], 1600  }
 0xa77   :  { %2658 = vsyncadd [#allocation4], 4294965696 }
 0xa78   :  { %2659 = dma.done.wait [#allocation21], 32  }
 0xa79   :  { %2660 = vsyncadd [#allocation21], 4294967264 }
 0xa7a   :  { %1809 = vsyncpa [#allocation3], 1 }
 0xa7b   :  { %1810 = vsyncpa [#allocation6], 1 }
 0xa7c   :  { %1811 = vsyncpa [#allocation9], 1 }
 0xa7d   :  { %1812 = vsyncpa [#allocation12], 1 }
 0xa7e   :  { %1813 = vsyncpa [#allocation15], 1 }
 0xa7f   :  { %1814 = vsyncpa [#allocation18], 1 }
 0xa80   :  { %1815 = vsyncpa [#allocation4], 1 }
 0xa81   :  { %1816 = vsyncpa [#allocation21], 1 }

</bundles_post_ra>
